<compile_context>
chip_gen: v5e
topology: v5e:2x2
jax: 0.10.0
libtpu: 0.0.40
codegen_flags: <defaults>
</compile_context>

<pallas_src>
import jax
import jax.numpy as jnp
from jax.experimental import pallas as pl
from jax.experimental.pallas import tpu as pltpu

IN_CH = 36          # fc1 input features
OUT_CH = 20         # fc3 / fc4 output features
K_PAD = 64          # padded fc1 contraction dim (MXU-friendly K)
OUT_PAD = 128       # padded fc3/fc4 output dim (lane-dense output store)
MAX_BT = 1024       # cap on batch rows per grid step


def _pick_bt(batch):
    """Largest batch tile (multiple of 128, <= MAX_BT) that still leaves
    >= 2 grid blocks so v7x's two TensorCores both get work."""
    chunks = pl.cdiv(batch, 128)              # number of 128-row chunks
    per_block = max(1, pl.cdiv(chunks, 2))    # aim for ~2 grid blocks
    return int(min(MAX_BT // 128, per_block) * 128)


def simplenn_kernel(x_ref,
                    w1_ref, b1_ref, w2_ref, b2_ref,
                    w3_ref, b3_ref, w4_ref, b4_ref,
                    out_ref, xpad_ref):
    # In-kernel cast + zero-pad of the 36 input channels to K_PAD=64.
    # Exact: padded w1 rows are zero, padded activations are zero.
    xpad_ref[...] = jnp.zeros_like(xpad_ref)
    xpad_ref[:, :IN_CH] = x_ref[...].astype(jnp.bfloat16)
    x = xpad_ref[...]                                                   # (BT,64) bf16

    # fc1 + ReLU:  (BT,64)@(64,128), f32 accumulate
    h = jnp.dot(x, w1_ref[...], preferred_element_type=jnp.float32) + b1_ref[...]
    h = jnp.maximum(h, 0.0).astype(jnp.bfloat16)                        # (BT,128)

    # fc2 + ReLU:  (BT,128)@(128,256)
    h = jnp.dot(h, w2_ref[...], preferred_element_type=jnp.float32) + b2_ref[...]
    h = jnp.maximum(h, 0.0).astype(jnp.bfloat16)                        # (BT,256)

    # fc3 + ReLU:  (BT,256)@(256,128)  (cols 20..127 are exact zeros)
    h = jnp.dot(h, w3_ref[...], preferred_element_type=jnp.float32) + b3_ref[...]
    h = jnp.maximum(h, 0.0).astype(jnp.bfloat16)                        # (BT,128)

    # fc4 (no activation): (BT,128)@(128,128); bf16 store (lane-dense, half
    # the writeback bytes of f32).
    out = jnp.dot(h, w4_ref[...], preferred_element_type=jnp.float32) + b4_ref[...]
    out_ref[...] = out.astype(out_ref.dtype)                            # (BT,128) bf16


@jax.jit
def simplenn_forward_padded(x, kparams):
    """x: (B, 36) f32; kparams: output of prepare_params().
    Returns the padded logits slab (B, OUT_PAD) bf16; real logits are
    columns [:OUT_CH] (slice lazily / fuse downstream)."""
    w1p, b1, w2p, b2, w3p, b3p, w4p, b4p = kparams
    B, C = x.shape
    assert C == IN_CH

    bt = _pick_bt(B)
    n_blocks = pl.cdiv(B, bt)                 # ragged last block handled by Pallas

    def full_spec(arr):
        # Whole parameter array as one resident VMEM block (constant index_map).
        return pl.BlockSpec(arr.shape, lambda i: (0, 0))

    # NOTE: if xprof shows exposed input DMA, add pipeline_mode=pl.Buffered(3)
    # on the x spec; default double-buffering suffices at these block sizes.
    in_specs = [pl.BlockSpec((bt, IN_CH), lambda i: (i, 0))] + [
        full_spec(p) for p in kparams]
    out_spec = pl.BlockSpec((bt, OUT_PAD), lambda i: (i, 0))

    flops = 2 * B * (K_PAD * 128 + 128 * 256 + 256 * OUT_PAD + OUT_PAD * OUT_PAD)
    bytes_accessed = (
        int(x.size) * 4
        + sum(int(p.size) * p.dtype.itemsize for p in kparams)
        + B * OUT_PAD * 2)

    return pl.pallas_call(
        simplenn_kernel,
        out_shape=jax.ShapeDtypeStruct((B, OUT_PAD), jnp.bfloat16),
        grid_spec=pltpu.PrefetchScalarGridSpec(
            num_scalar_prefetch=0,
            grid=(n_blocks,),
            in_specs=in_specs,
            out_specs=out_spec,
            scratch_shapes=[pltpu.VMEM((bt, K_PAD), jnp.bfloat16)],
        ),
        compiler_params=pltpu.CompilerParams(
            dimension_semantics=("parallel",),
            vmem_limit_bytes=32 * 1024 * 1024,   # safe on v5e's 16 MiB default
        ),
        cost_estimate=pl.CostEstimate(
            flops=flops, transcendentals=0, bytes_accessed=bytes_accessed),
    )(x, *kparams)


def simplenn_logits(x, kparams):
    """Convenience wrapper giving the module's exact (B, 20) output.
    The slice is a separate pass over the output; prefer consuming the padded
    slab directly when possible."""
    return simplenn_forward_padded(x, kparams)[:, :OUT_CH].astype(jnp.float32)


def prepare_params(params):
    """One-time (init-time) pad + bf16 cast of the Linear weights, cached so
    the per-call path contains no XLA pad/convert kernels.  Padding is exact
    zeros, so sliced results are bit-identical math."""
    w1, b1, w2, b2, w3, b3, w4, b4 = params
    w1p = jnp.pad(w1, ((0, K_PAD - IN_CH), (0, 0))).astype(jnp.bfloat16)        # (64,128)
    w2p = w2.astype(jnp.bfloat16)                                               # (128,256)
    w3p = jnp.pad(w3, ((0, 0), (0, OUT_PAD - OUT_CH))).astype(jnp.bfloat16)     # (256,128)
    b3p = jnp.pad(b3, ((0, 0), (0, OUT_PAD - OUT_CH)))                          # (1,128) f32
    w4p = jnp.pad(w4, ((0, OUT_PAD - OUT_CH),
                       (0, OUT_PAD - OUT_CH))).astype(jnp.bfloat16)             # (128,128)
    b4p = jnp.pad(b4, ((0, 0), (0, OUT_PAD - OUT_CH)))                          # (1,128) f32
    return (w1p, b1, w2p, b2, w3p, b3p, w4p, b4p)


def init_params(key):
    """PyTorch-style nn.Linear init (uniform +-1/sqrt(fan_in)).
    Weights stored transposed as (in, out) so the kernel computes x @ W;
    biases kept 2D (1, out)."""
    dims = [(IN_CH, 128), (128, 256), (256, OUT_CH), (OUT_CH, OUT_CH)]
    params = []
    for (din, dout) in dims:
        key, kw, kb = jax.random.split(key, 3)
        scale = 1.0 / jnp.sqrt(jnp.float32(din))
        w = jax.random.uniform(kw, (din, dout), jnp.float32, -scale, scale)
        b = jax.random.uniform(kb, (1, dout), jnp.float32, -scale, scale)
        params += [w, b]
    return tuple(params)


def simplenn_reference(x, params):
    """Pure-JAX reference mirroring the kernel numerics (bf16 MXU inputs,
    f32 accumulate, bf16 final store)."""
    w1, b1, w2, b2, w3, b3, w4, b4 = params

    def mm(a, w):
        return jnp.dot(a.astype(jnp.bfloat16), w.astype(jnp.bfloat16),
                       preferred_element_type=jnp.float32)

    h = jax.nn.relu(mm(x, w1) + b1)
    h = jax.nn.relu(mm(h, w2) + b2)
    h = jax.nn.relu(mm(h, w3) + b3)
    return (mm(h, w4) + b4).astype(jnp.bfloat16).astype(jnp.float32)


if __name__ == "__main__":
    key = jax.random.PRNGKey(0)
    kparam, kx = jax.random.split(key)

    params = init_params(kparam)
    kparams = jax.block_until_ready(prepare_params(params))   # one-time prep

    B = 512                                    # -> BT=256, grid of 2 blocks
    x = jax.random.normal(kx, (B, IN_CH), jnp.float32)

    out_pad = jax.block_until_ready(simplenn_forward_padded(x, kparams))
    assert out_pad.shape == (B, OUT_PAD) and out_pad.dtype == jnp.bfloat16

    # Consumer-side (cold path) slice to the module's (B, 20) logits.
    out = out_pad[:, :OUT_CH].astype(jnp.float32)

    ref = simplenn_reference(x, params)
    assert out.shape == (B, OUT_CH)
    assert jnp.allclose(out, ref, atol=1e-2, rtol=1e-2)

    print("KERNEL_OK")
</pallas_src>

<mosaic_0001>
module attributes {stable_mosaic.version = 11 : i64} {
  func.func @simplenn_kernel(%arg0: i32, %arg1: memref<256x36xf32, #tpu.memory_space<vmem>>, %arg2: memref<64x128xbf16, #tpu.memory_space<vmem>>, %arg3: memref<1x128xf32, #tpu.memory_space<vmem>>, %arg4: memref<128x256xbf16, #tpu.memory_space<vmem>>, %arg5: memref<1x256xf32, #tpu.memory_space<vmem>>, %arg6: memref<256x128xbf16, #tpu.memory_space<vmem>>, %arg7: memref<1x128xf32, #tpu.memory_space<vmem>>, %arg8: memref<128x128xbf16, #tpu.memory_space<vmem>>, %arg9: memref<1x128xf32, #tpu.memory_space<vmem>>, %arg10: memref<256x128xbf16, #tpu.memory_space<vmem>>, %arg11: memref<256x64xbf16, #tpu.memory_space<vmem>>) attributes {dimension_semantics = [#tpu.dimension_semantics<parallel>], iteration_bounds = array<i64: 2>, scalar_prefetch = 0 : i64, scratch_operands = 1 : i64, tpu.core_type = #tpu.core_type<tc>, window_params = [{transform_indices = @transform_0, window_bounds = array<i64: 256, 36>}, {pipeline_mode = #tpu.pipeline_mode<synchronous>, transform_indices = @transform_1, window_bounds = array<i64: 64, 128>}, {pipeline_mode = #tpu.pipeline_mode<synchronous>, transform_indices = @transform_2, window_bounds = array<i64: 1, 128>}, {pipeline_mode = #tpu.pipeline_mode<synchronous>, transform_indices = @transform_3, window_bounds = array<i64: 128, 256>}, {pipeline_mode = #tpu.pipeline_mode<synchronous>, transform_indices = @transform_4, window_bounds = array<i64: 1, 256>}, {pipeline_mode = #tpu.pipeline_mode<synchronous>, transform_indices = @transform_5, window_bounds = array<i64: 256, 128>}, {pipeline_mode = #tpu.pipeline_mode<synchronous>, transform_indices = @transform_6, window_bounds = array<i64: 1, 128>}, {pipeline_mode = #tpu.pipeline_mode<synchronous>, transform_indices = @transform_7, window_bounds = array<i64: 128, 128>}, {pipeline_mode = #tpu.pipeline_mode<synchronous>, transform_indices = @transform_8, window_bounds = array<i64: 1, 128>}, {transform_indices = @transform_9, window_bounds = array<i64: 256, 128>}]} {
    %cst = arith.constant 0.000000e+00 : bf16
    %0 = vector.broadcast %cst : bf16 to vector<256x64xbf16>
    %c0 = arith.constant 0 : index
    %c0_0 = arith.constant 0 : index
    %1 = vector.load %arg11[%c0, %c0_0] : memref<256x64xbf16, #tpu.memory_space<vmem>>, vector<256x64xbf16>
    tpu.vector_store %arg11[%c0, %c0_0], %0 {strides = array<i32>} : memref<256x64xbf16, #tpu.memory_space<vmem>>, vector<256x64xbf16>,
    %c0_1 = arith.constant 0 : index
    %c0_2 = arith.constant 0 : index
    %2 = vector.load %arg1[%c0_1, %c0_2] : memref<256x36xf32, #tpu.memory_space<vmem>>, vector<256x36xf32>
    %3 = arith.truncf %2 : vector<256x36xf32> to vector<256x36xbf16>
    %c0_3 = arith.constant 0 : index
    %c0_4 = arith.constant 0 : index
    %4 = vector.load %arg11[%c0_3, %c0_4] : memref<256x64xbf16, #tpu.memory_space<vmem>>, vector<256x36xbf16>
    tpu.vector_store %arg11[%c0_3, %c0_4], %3 {strides = array<i32>} : memref<256x64xbf16, #tpu.memory_space<vmem>>, vector<256x36xbf16>,
    %c0_5 = arith.constant 0 : index
    %c0_6 = arith.constant 0 : index
    %5 = vector.load %arg11[%c0_5, %c0_6] : memref<256x64xbf16, #tpu.memory_space<vmem>>, vector<256x64xbf16>
    %c0_7 = arith.constant 0 : index
    %c0_8 = arith.constant 0 : index
    %6 = vector.load %arg2[%c0_7, %c0_8] : memref<64x128xbf16, #tpu.memory_space<vmem>>, vector<64x128xbf16>
    %cst_9 = arith.constant dense<0.000000e+00> : vector<256x128xf32>
    %7 = tpu.matmul %5, %6, %cst_9 {dimension_numbers = #tpu.dot_dimension_numbers<[1], [0], [0], [1], [0, 0, 1, 1], [], []>} : vector<256x64xbf16>, vector<64x128xbf16>, vector<256x128xf32> -> vector<256x128xf32>
    %c0_10 = arith.constant 0 : index
    %c0_11 = arith.constant 0 : index
    %8 = vector.load %arg3[%c0_10, %c0_11] : memref<1x128xf32, #tpu.memory_space<vmem>>, vector<1x128xf32>
    %9 = vector.broadcast %8 : vector<1x128xf32> to vector<256x128xf32>
    %10 = arith.addf %7, %9 : vector<256x128xf32>
    %cst_12 = arith.constant 0.000000e+00 : f32
    %11 = vector.broadcast %cst_12 : f32 to vector<256x128xf32>
    %12 = arith.maximumf %10, %11 : vector<256x128xf32>
    %13 = arith.truncf %12 : vector<256x128xf32> to vector<256x128xbf16>
    %c0_13 = arith.constant 0 : index
    %c0_14 = arith.constant 0 : index
    %14 = vector.load %arg4[%c0_13, %c0_14] : memref<128x256xbf16, #tpu.memory_space<vmem>>, vector<128x256xbf16>
    %cst_15 = arith.constant dense<0.000000e+00> : vector<256x256xf32>
    %15 = tpu.matmul %13, %14, %cst_15 {dimension_numbers = #tpu.dot_dimension_numbers<[1], [0], [0], [1], [0, 0, 1, 1], [], []>} : vector<256x128xbf16>, vector<128x256xbf16>, vector<256x256xf32> -> vector<256x256xf32>
    %c0_16 = arith.constant 0 : index
    %c0_17 = arith.constant 0 : index
    %16 = vector.load %arg5[%c0_16, %c0_17] : memref<1x256xf32, #tpu.memory_space<vmem>>, vector<1x256xf32>
    %17 = vector.broadcast %16 : vector<1x256xf32> to vector<256x256xf32>
    %18 = arith.addf %15, %17 : vector<256x256xf32>
    %cst_18 = arith.constant 0.000000e+00 : f32
    %19 = vector.broadcast %cst_18 : f32 to vector<256x256xf32>
    %20 = arith.maximumf %18, %19 : vector<256x256xf32>
    %21 = arith.truncf %20 : vector<256x256xf32> to vector<256x256xbf16>
    %c0_19 = arith.constant 0 : index
    %c0_20 = arith.constant 0 : index
    %22 = vector.load %arg6[%c0_19, %c0_20] : memref<256x128xbf16, #tpu.memory_space<vmem>>, vector<256x128xbf16>
    %cst_21 = arith.constant dense<0.000000e+00> : vector<256x128xf32>
    %23 = tpu.matmul %21, %22, %cst_21 {dimension_numbers = #tpu.dot_dimension_numbers<[1], [0], [0], [1], [0, 0, 1, 1], [], []>} : vector<256x256xbf16>, vector<256x128xbf16>, vector<256x128xf32> -> vector<256x128xf32>
    %c0_22 = arith.constant 0 : index
    %c0_23 = arith.constant 0 : index
    %24 = vector.load %arg7[%c0_22, %c0_23] : memref<1x128xf32, #tpu.memory_space<vmem>>, vector<1x128xf32>
    %25 = vector.broadcast %24 : vector<1x128xf32> to vector<256x128xf32>
    %26 = arith.addf %23, %25 : vector<256x128xf32>
    %cst_24 = arith.constant 0.000000e+00 : f32
    %27 = vector.broadcast %cst_24 : f32 to vector<256x128xf32>
    %28 = arith.maximumf %26, %27 : vector<256x128xf32>
    %29 = arith.truncf %28 : vector<256x128xf32> to vector<256x128xbf16>
    %c0_25 = arith.constant 0 : index
    %c0_26 = arith.constant 0 : index
    %30 = vector.load %arg8[%c0_25, %c0_26] : memref<128x128xbf16, #tpu.memory_space<vmem>>, vector<128x128xbf16>
    %cst_27 = arith.constant dense<0.000000e+00> : vector<256x128xf32>
    %31 = tpu.matmul %29, %30, %cst_27 {dimension_numbers = #tpu.dot_dimension_numbers<[1], [0], [0], [1], [0, 0, 1, 1], [], []>} : vector<256x128xbf16>, vector<128x128xbf16>, vector<256x128xf32> -> vector<256x128xf32>
    %c0_28 = arith.constant 0 : index
    %c0_29 = arith.constant 0 : index
    %32 = vector.load %arg9[%c0_28, %c0_29] : memref<1x128xf32, #tpu.memory_space<vmem>>, vector<1x128xf32>
    %33 = vector.broadcast %32 : vector<1x128xf32> to vector<256x128xf32>
    %34 = arith.addf %31, %33 : vector<256x128xf32>
    %35 = arith.truncf %34 : vector<256x128xf32> to vector<256x128xbf16>
    %c0_30 = arith.constant 0 : index
    %c0_31 = arith.constant 0 : index
    %36 = vector.load %arg10[%c0_30, %c0_31] : memref<256x128xbf16, #tpu.memory_space<vmem>>, vector<256x128xbf16>
    tpu.vector_store %arg10[%c0_30, %c0_31], %35 {strides = array<i32>} : memref<256x128xbf16, #tpu.memory_space<vmem>>, vector<256x128xbf16>,
    return
  }
  func.func @transform_0(%arg0: i32) -> (i32, i32) {
    %c0_i32 = arith.constant 0 : i32
    %c0_i32_0 = arith.constant 0 : i32
    return %arg0, %c0_i32 : i32, i32
  }
  func.func @transform_1(%arg0: i32) -> (i32, i32) {
    %c0_i32 = arith.constant 0 : i32
    %c0_i32_0 = arith.constant 0 : i32
    %c0_i32_1 = arith.constant 0 : i32
    return %c0_i32, %c0_i32_0 : i32, i32
  }
  func.func @transform_2(%arg0: i32) -> (i32, i32) {
    %c0_i32 = arith.constant 0 : i32
    %c0_i32_0 = arith.constant 0 : i32
    %c0_i32_1 = arith.constant 0 : i32
    return %c0_i32, %c0_i32_0 : i32, i32
  }
  func.func @transform_3(%arg0: i32) -> (i32, i32) {
    %c0_i32 = arith.constant 0 : i32
    %c0_i32_0 = arith.constant 0 : i32
    %c0_i32_1 = arith.constant 0 : i32
    return %c0_i32, %c0_i32_0 : i32, i32
  }
  func.func @transform_4(%arg0: i32) -> (i32, i32) {
    %c0_i32 = arith.constant 0 : i32
    %c0_i32_0 = arith.constant 0 : i32
    %c0_i32_1 = arith.constant 0 : i32
    return %c0_i32, %c0_i32_0 : i32, i32
  }
  func.func @transform_5(%arg0: i32) -> (i32, i32) {
    %c0_i32 = arith.constant 0 : i32
    %c0_i32_0 = arith.constant 0 : i32
    %c0_i32_1 = arith.constant 0 : i32
    return %c0_i32, %c0_i32_0 : i32, i32
  }
  func.func @transform_6(%arg0: i32) -> (i32, i32) {
    %c0_i32 = arith.constant 0 : i32
    %c0_i32_0 = arith.constant 0 : i32
    %c0_i32_1 = arith.constant 0 : i32
    return %c0_i32, %c0_i32_0 : i32, i32
  }
  func.func @transform_7(%arg0: i32) -> (i32, i32) {
    %c0_i32 = arith.constant 0 : i32
    %c0_i32_0 = arith.constant 0 : i32
    %c0_i32_1 = arith.constant 0 : i32
    return %c0_i32, %c0_i32_0 : i32, i32
  }
  func.func @transform_8(%arg0: i32) -> (i32, i32) {
    %c0_i32 = arith.constant 0 : i32
    %c0_i32_0 = arith.constant 0 : i32
    %c0_i32_1 = arith.constant 0 : i32
    return %c0_i32, %c0_i32_0 : i32, i32
  }
  func.func @transform_9(%arg0: i32) -> (i32, i32) {
    %c0_i32 = arith.constant 0 : i32
    %c0_i32_0 = arith.constant 0 : i32
    return %arg0, %c0_i32 : i32, i32
  }
}

</mosaic_0001>

<bundles_post_ra>
// kernel: simplenn_forward_padded.1
= control target key start
LH: loop header
LB: loop body
LE: loop exit
PB: predicated region body
PF: predicated region fallthrough
CT: control target
= control target key end

     0   :  { %14 = vsyncpa [#allocation4], 0  ;;  %s3140_s0 = inlined_call_operand.vmem [shape: f32[512,36], index: 0, kind: input, shape index: {}]   ;;  %s3141_s1 = inlined_call_operand.vmem [shape: bf16[64,128], index: 1, kind: input, shape index: {}]   ;;  %s3142_s2 = inlined_call_operand.vmem [shape: f32[1,128], index: 2, kind: input, shape index: {}]   ;;  %s3143_s3 = inlined_call_operand.vmem [shape: bf16[128,256], index: 3, kind: input, shape index: {}]   ;;  %s3144_s4 = inlined_call_operand.vmem [shape: f32[1,256], index: 4, kind: input, shape index: {}]   ;;  %s3145_s5 = inlined_call_operand.vmem [shape: bf16[256,128], index: 5, kind: input, shape index: {}]   ;;  %s3146_s6 = inlined_call_operand.vmem [shape: f32[1,128], index: 6, kind: input, shape index: {}]   ;;  %s3147_s7 = inlined_call_operand.vmem [shape: bf16[128,128], index: 7, kind: input, shape index: {}]   ;;  %s3148_s8 = inlined_call_operand.vmem [shape: f32[1,128], index: 8, kind: input, shape index: {}]   ;;  %s3149_s9 = inlined_call_operand.hbm [shape: bf16[512,128], index: 9, kind: output, shape index: {}]  }
   0x1   :  { %16 = vsyncpa [#allocation4 + $0x1], 0  ;;  %s2430_s30 = smov 0   ;;  %s2432_s10 = smov 0  }
   0x2   :  { %s2434_s11 = smov 0   ;;  %s2436_s12 = smov 0  }
   0x3 LB: > { %s2451_s13 = sadd.s32 4294967295, %s2375_s12   ;;  %s1832_s14 = sadd.s32 4294967294, %s2375_s12   ;;  %s2375_s12 = sphi %s2436_s12, %s3155_s12   ;;  %s2371_s11 = sphi %s2434_s11, %s3154_s11   ;;  %s2367_s10 = sphi %s2432_s10, %s3153_s10   ;;  %s2363_s30 = sphi %s2430_s30, %s3152_s30  }
   0x4   : > { %s2455_s15 = sadd.s32 1, %s2375_s12   ;;  %s223_s16 = sadd.s32 1, %s2371_s11 }
   0x5   : > { %s220_s17 = ssub.s32 %s2375_s12, %s2455_s15  ;;  %p233_p0 = scmp.ne.s32.totalorder %s2371_s11, %s2367_s10 }
   0x6   : > { %p221_p1 = scmp.eq.s32.totalorder %s220_s17, 0  ;;  %p234_p2 = scmp.eq.s32.totalorder %s2451_s13, 1 }
   0x7   : > { %p239_p3 = scmp.ne.s32.totalorder %s2367_s10, %s2363_s30  ;;  %p240_p4 = scmp.eq.s32.totalorder %s1832_s14, 1 }
   0x8   : > { %s2466_s18 = scalar_select %p221_p1, %s2371_s11, %s223_s16  }
   0x9   : > { %p2468_p5 = por %p234_p2, %p233_p0  ;;  %p2472_p6 = por %p240_p4, %p239_p3 }
   0xa   : > { %p1835_p7 = scmp.ge.s32.totalorder %s2375_s12, 1  ;;  %p291_p8 = scmp.lt.s32.totalorder %s2375_s12, 3 }
   0xc   : > { %p292_p9 = pnand %p1835_p7, %p291_p8 }
   0xd   : > { %s1837_s23 = sshll.u32 (!%p292_p9), %s2451_s13, 5  ;;  %s2160_s27 = sshll.u32 (!%p292_p9), %s2451_s13, 7 }
   0xe   : > { %295 = sbr.rel (%p292_p9) target bundleno = 1111 (0x457), region = 56  ;;  %p328_p10 = scmp.lt.s32.totalorder (!%p292_p9), %s1837_s23, 63 }
   0xf   : > { %s1766_s14 = scalar_lea.hbm (!%p292_p9), %s3149_s9, %s2160_s27  ;;  %s2333_s27 = scalar_lea.hbm (!%p292_p9), %s3149_s9, 256 }
  0x10   : > { %s1769_s21 = sshll.u32 (!%p292_p9), %s1766_s14, 4  ;;  %s1770_s21 = int_to_ptr.hbm [resolvable:$true] %s1769_s21 }
  0x13   : > { %v2119_v0 = vld [vmem:[%s3141_s1 + $0x18] sm:$0xff]  ;;  %vm335_vm0 = vcmask 519168   ;;  %v2118_v1 = vld [vmem:[%s3141_s1 + $0x10] sm:$0xff]  ;;  %v2377_v2 = vmov 0   ;;  %s3157_s23 = smov (!%p328_p10, %s1837_s23), 63  ;;  %v2117_v3 = vld [vmem:[%s3141_s1 + $0x8] sm:$0xff] }
  0x14   : > { %336 = vst.msk [vmem:[#allocation2] sm:$0xf] %vm335_vm0, %v2377_v2  ;;  %666 = vmatpush.bf16.msra.mxu0 %v2119_v0  ;;  %2256 = vmatpush.bf16.msra.mxu3 %v2119_v0  ;;  %s1838_s26 = sshll.u32 %s3157_s23, 3  ;;  %vm432_vm1 = vcmask 289792   ;;  %v2116_v8 = vld [vmem:[%s3141_s1] sm:$0xff]  ;;  %vm613_vm2 = vcmask 523264  }
  0x15   : > { %337 = vst.msk [vmem:[#allocation2 + $0x4] sm:$0xf] %vm335_vm0, %v2377_v2  ;;  %s2501_s16 = scalar_lea.vmem %s3140_s0, %s1838_s26  ;;  %v1993_v38 = vld [vmem:[%s3143_s3 + $0x70] sm:$0xf]  ;;  %v2135_v39 = vld [vmem:[%s3143_s3 + $0x74] sm:$0xf0] }
  0x16   : > { %338 = vst.msk [vmem:[#allocation2 + $0x8] sm:$0xf] %vm335_vm0, %v2377_v2  ;;  %v368_v4 = vld [vmem:[%s2501_s16] sm:$0xff]  ;;  %v369_v5 = vld [vmem:[%s2501_s16 + $0x8] sm:$0xff]  ;;  %v370_v10 = vld [vmem:[%s2501_s16 + $0x10] sm:$0xff]  ;;  %v1994_v41 = vor.u32 %v2135_v39, %v1993_v38  ;;  %s2327_s23 = sshra.s32 %s1770_s21, 4  ;;  %s2328_s23 = int_to_ptr.hbm [resolvable:$true] %s2327_s23 }
  0x17   : > { %339 = vst.msk [vmem:[#allocation2 + $0xc] sm:$0xf] %vm335_vm0, %v2377_v2  ;;  %v400_v6 = vpack.c.bf16 %v368_v4, %v368_v4  ;;  %v401_v7 = vpack.c.bf16 %v369_v5, %v369_v5  ;;  %v371_v11 = vld [vmem:[%s2501_s16 + $0x18] sm:$0xff]  ;;  %v372_v12 = vld [vmem:[%s2501_s16 + $0x20] sm:$0xff]  ;;  %v402_v13 = vpack.c.bf16 %v370_v10, %v370_v10  ;;  %v373_v14 = vld [vmem:[%s2501_s16 + $0x28] sm:$0xff]  ;;  %s2329_s13 = scalar_lea.hbm %s2328_s23, 128  ;;  %p2334_p0 = scmp.lt.s32.totalorder %s2328_s23, %s3149_s9 }
  0x18   : > { %340 = vst.msk [vmem:[#allocation2 + $0x10] sm:$0xf] %vm335_vm0, %v2377_v2  ;;  %667 = vmatpush.bf16.msra.mxu0 %v2118_v1  ;;  %2257 = vmatpush.bf16.msra.mxu3 %v2118_v1  ;;  %v403_v15 = vpack.c.bf16 %v371_v11, %v371_v11  ;;  %v374_v16 = vld [vmem:[%s2501_s16 + $0x30] sm:$0xff]  ;;  %v404_v17 = vpack.c.bf16 %v372_v12, %v372_v12  ;;  %v375_v18 = vld [vmem:[%s2501_s16 + $0x38] sm:$0xff]  ;;  %v376_v23 = vld [vmem:[%s2501_s16 + $0x40] sm:$0xff]  ;;  %p2330_p11 = scmp.ne.s32.totalorder %s2328_s23, %s2329_s13  ;;  %p2335_p1 = scmp.lt.s32.totalorder %s2333_s27, %s2329_s13 }
  0x19   : > { %341 = vst.msk [vmem:[#allocation2 + $0x14] sm:$0xf] %vm335_vm0, %v2377_v2  ;;  %v405_v19 = vpack.c.bf16 %v373_v14, %v373_v14  ;;  %v406_v20 = vpack.c.bf16 %v374_v16, %v374_v16  ;;  %v407_v21 = vpack.c.bf16 %v375_v18, %v375_v18  ;;  %v377_v24 = vld [vmem:[%s2501_s16 + $0x48] sm:$0xff]  ;;  %v408_v25 = vpack.c.bf16 %v376_v23, %v376_v23  ;;  %v378_v28 = vld [vmem:[%s2501_s16 + $0x50] sm:$0xff]  ;;  %v379_v29 = vld [vmem:[%s2501_s16 + $0x58] sm:$0xff] }
  0x1a   : > { %342 = vst.msk [vmem:[#allocation2 + $0x18] sm:$0xf] %vm335_vm0, %v2377_v2  ;;  %v409_v26 = vpack.c.bf16 %v377_v24, %v377_v24  ;;  %v410_v30 = vpack.c.bf16 %v378_v28, %v378_v28  ;;  %v411_v31 = vpack.c.bf16 %v379_v29, %v379_v29  ;;  %v380_v33 = vld [vmem:[%s2501_s16 + $0x60] sm:$0xff]  ;;  %v381_v34 = vld [vmem:[%s2501_s16 + $0x68] sm:$0xff]  ;;  %v382_v40 = vld [vmem:[%s2501_s16 + $0x70] sm:$0xff]  ;;  %901 = vmatpush.bf16.msra.mxu1 %v1994_v41  ;;  %p2331_p12 = pnand %p2330_p11, %p2468_p5  ;;  %p2336_p2 = por %p2335_p1, %p2334_p0 }
  0x1b   : > { %343 = vst.msk [vmem:[#allocation2 + $0x1c] sm:$0xf] %vm335_vm0, %v2377_v2  ;;  %v412_v35 = vpack.c.bf16 %v380_v33, %v380_v33  ;;  %v413_v36 = vpack.c.bf16 %v381_v34, %v381_v34  ;;  %v383_v42 = vld [vmem:[%s2501_s16 + $0x78] sm:$0xff]  ;;  %v414_v43 = vpack.c.bf16 %v382_v40, %v382_v40  ;;  %2260 = vmatpush.bf16.msra.mxu2 %v1994_v41  ;;  %v1985_v46 = vld [vmem:[%s3143_s3 + $0x60] sm:$0xf]  ;;  %v385_v55 = vld [vmem:[%s2501_s16 + $0x88] sm:$0xff] }
  0x1c   : > { %344 = vst.msk [vmem:[#allocation2 + $0x20] sm:$0xf] %vm335_vm0, %v2377_v2  ;;  %668 = vmatpush.bf16.msra.mxu0 %v2117_v3  ;;  %2258 = vmatpush.bf16.msra.mxu3 %v2117_v3  ;;  %v415_v44 = vpack.c.bf16 %v383_v42, %v383_v42  ;;  %v2133_v47 = vld [vmem:[%s3143_s3 + $0x64] sm:$0xf0]  ;;  %v1977_v49 = vld [vmem:[%s3143_s3 + $0x50] sm:$0xf]  ;;  %v417_v58 = vpack.c.bf16 %v385_v55, %v385_v55  ;;  %p2332_p13 = pneg %p2331_p12 }
  0x1d   : > { %433 = vst.msk [vmem:[#allocation2] sm:$0xf] %vm432_vm1, %v400_v6  ;;  %v1986_v48 = vor.u32 %v2133_v47, %v1985_v46  ;;  %v2131_v50 = vld [vmem:[%s3143_s3 + $0x54] sm:$0xf0]  ;;  %v1969_v52 = vld [vmem:[%s3143_s3 + $0x40] sm:$0xf] }
  0x1e   : > { %434 = vst.msk [vmem:[#allocation2 + $0x4] sm:$0xf] %vm432_vm1, %v401_v7  ;;  %v1978_v51 = vor.u32 %v2131_v50, %v1977_v49  ;;  %v2129_v53 = vld [vmem:[%s3143_s3 + $0x44] sm:$0xf0]  ;;  %v384_v54 = vld [vmem:[%s2501_s16 + $0x80] sm:$0xff]  ;;  %v386_v59 = vld [vmem:[%s2501_s16 + $0x90] sm:$0xff]  ;;  %p2337_p3 = pnand %p2336_p2, %p2332_p13 }
  0x1f   : > { %345 = vst.msk [vmem:[#allocation2 + $0x24] sm:$0xf] %vm335_vm0, %v2377_v2  ;;  %902 = vmatpush.bf16.msra.mxu1 %v1986_v48  ;;  %2261 = vmatpush.bf16.msra.mxu2 %v1986_v48  ;;  %v1970_v56 = vor.u32 %v2129_v53, %v1969_v52  ;;  %v416_v57 = vpack.c.bf16 %v384_v54, %v384_v54  ;;  %v387_v60 = vld [vmem:[%s2501_s16 + $0x98] sm:$0xff]  ;;  %v1961_v61 = vld [vmem:[%s3143_s3 + $0x30] sm:$0xf]  ;;  %v389_v14 = vld [vmem:[%s2501_s16 + $0xa8] sm:$0xff] }
  0x20   : > { %346 = vst.msk [vmem:[#allocation2 + $0x28] sm:$0xf] %vm335_vm0, %v2377_v2  ;;  %669 = vmatpush.bf16.msra.mxu0 %v2116_v8  ;;  %2259 = vmatpush.bf16.msra.mxu3 %v2116_v8  ;;  %v2127_v62 = vld [vmem:[%s3143_s3 + $0x34] sm:$0xf0]  ;;  %v418_v63 = vpack.c.bf16 %v386_v59, %v386_v59  ;;  %v419_v0 = vpack.c.bf16 %v387_v60, %v387_v60  ;;  %v1953_v3 = vld [vmem:[%s3143_s3 + $0x20] sm:$0xf] }
  0x21   : > { %347 = vst.msk [vmem:[#allocation2 + $0x2c] sm:$0xf] %vm335_vm0, %v2377_v2  ;;  %v1962_v1 = vor.u32 %v2127_v62, %v1961_v61  ;;  %v2125_v4 = vld [vmem:[%s3143_s3 + $0x24] sm:$0xf0]  ;;  %v1945_v6 = vld [vmem:[%s3143_s3 + $0x10] sm:$0xf]  ;;  %v421_v16 = vpack.c.bf16 %v389_v14, %v389_v14 }
  0x22   : > { %348 = vst.msk [vmem:[#allocation2 + $0x30] sm:$0xf] %vm335_vm0, %v2377_v2  ;;  %v1954_v5 = vor.u32 %v2125_v4, %v1953_v3  ;;  %v2123_v7 = vld [vmem:[%s3143_s3 + $0x14] sm:$0xf0]  ;;  %v1937_v10 = vld [vmem:[%s3143_s3] sm:$0xf] }
  0x23   : > { %349 = vst.msk [vmem:[#allocation2 + $0x34] sm:$0xf] %vm335_vm0, %v2377_v2  ;;  %903 = vmatpush.bf16.msra.mxu1 %v1978_v51  ;;  %2262 = vmatpush.bf16.msra.mxu2 %v1978_v51  ;;  %v2121_v11 = vld [vmem:[%s3143_s3 + $0x4] sm:$0xf0]  ;;  %v392_v33 = vld [vmem:[%s2501_s16 + $0xc0] sm:$0xff]  ;;  %v394_v42 = vld [vmem:[%s2501_s16 + $0xd0] sm:$0xff] }
  0x24   : > { %350 = vst.msk [vmem:[#allocation2 + $0x38] sm:$0xf] %vm335_vm0, %v2377_v2  ;;  %v1938_v12 = vor.u32 %v2121_v11, %v1937_v10  ;;  %v393_v34 = vld [vmem:[%s2501_s16 + $0xc8] sm:$0xff]  ;;  %v396_v54 = vld [vmem:[%s2501_s16 + $0xe0] sm:$0xff]  ;;  %v399_v3 = vld [vmem:[%s2501_s16 + $0xf8] sm:$0xff] }
  0x25   : > { %v2100_v9 = vld [vmem:[#allocation2] sm:$0xff]  ;;  %351 = vst.msk [vmem:[#allocation2 + $0x3c] sm:$0xf] %vm335_vm0, %v2377_v2  ;;  %v397_v55 = vld [vmem:[%s2501_s16 + $0xe8] sm:$0xff] }
  0x26   : > { %352 = vst.msk [vmem:[#allocation2 + $0x40] sm:$0xf] %vm335_vm0, %v2377_v2  ;;  %1919 = vmatmul.msk.bf16.vlgmr.msra.gmra.mxu0 %vm613_vm2, %v2100_v9  ;;  %v1946_v9 = vor.u32 %v2123_v7, %v1945_v6 }
  0x27   : > { %353 = vst.msk [vmem:[#allocation2 + $0x44] sm:$0xf] %vm335_vm0, %v2377_v2  ;;  %904 = vmatpush.bf16.msra.mxu1 %v1970_v56  ;;  %2263 = vmatpush.bf16.msra.mxu2 %v1970_v56  ;;  %v428_v56 = vpack.c.bf16 %v396_v54, %v396_v54  ;;  %v2132_v54 = vld [vmem:[%s3143_s3 + $0x64] sm:$0xf] }
  0x28   : > { %354 = vst.msk [vmem:[#allocation2 + $0x48] sm:$0xf] %vm335_vm0, %v2377_v2 }
  0x29   : > { %355 = vst.msk [vmem:[#allocation2 + $0x4c] sm:$0xf] %vm335_vm0, %v2377_v2 }
  0x2a   : > { %356 = vst.msk [vmem:[#allocation2 + $0x50] sm:$0xf] %vm335_vm0, %v2377_v2 }
  0x2b   : > { %357 = vst.msk [vmem:[#allocation2 + $0x54] sm:$0xf] %vm335_vm0, %v2377_v2  ;;  %905 = vmatpush.bf16.msra.mxu1 %v1962_v1  ;;  %2264 = vmatpush.bf16.msra.mxu2 %v1962_v1 }
  0x2c   : > { %358 = vst.msk [vmem:[#allocation2 + $0x58] sm:$0xf] %vm335_vm0, %v2377_v2 }
  0x2d   : > { %359 = vst.msk [vmem:[#allocation2 + $0x5c] sm:$0xf] %vm335_vm0, %v2377_v2 }
  0x2e   : > { %360 = vst.msk [vmem:[#allocation2 + $0x60] sm:$0xf] %vm335_vm0, %v2377_v2 }
  0x2f   : > { %361 = vst.msk [vmem:[#allocation2 + $0x64] sm:$0xf] %vm335_vm0, %v2377_v2  ;;  %906 = vmatpush.bf16.msra.mxu1 %v1954_v5  ;;  %2265 = vmatpush.bf16.msra.mxu2 %v1954_v5  ;;  %v431_v5 = vpack.c.bf16 %v399_v3, %v399_v3 }
  0x30   : > { %362 = vst.msk [vmem:[#allocation2 + $0x68] sm:$0xf] %vm335_vm0, %v2377_v2 }
  0x31   : > { %363 = vst.msk [vmem:[#allocation2 + $0x6c] sm:$0xf] %vm335_vm0, %v2377_v2 }
  0x32   : > { %364 = vst.msk [vmem:[#allocation2 + $0x70] sm:$0xf] %vm335_vm0, %v2377_v2 }
  0x33   : > { %365 = vst.msk [vmem:[#allocation2 + $0x74] sm:$0xf] %vm335_vm0, %v2377_v2  ;;  %907 = vmatpush.bf16.msra.mxu1 %v1946_v9  ;;  %2266 = vmatpush.bf16.msra.mxu2 %v1946_v9 }
  0x34   : > { %366 = vst.msk [vmem:[#allocation2 + $0x78] sm:$0xf] %vm335_vm0, %v2377_v2 }
  0x35   : > { %367 = vst.msk [vmem:[#allocation2 + $0x7c] sm:$0xf] %vm335_vm0, %v2377_v2 }
  0x36   : > { %435 = vst.msk [vmem:[#allocation2 + $0x8] sm:$0xf] %vm432_vm1, %v402_v13  ;;  %v388_v13 = vld [vmem:[%s2501_s16 + $0xa0] sm:$0xff] }
  0x37   : > { %436 = vst.msk [vmem:[#allocation2 + $0xc] sm:$0xf] %vm432_vm1, %v403_v15  ;;  %v420_v15 = vpack.c.bf16 %v388_v13, %v388_v13  ;;  %908 = vmatpush.bf16.msra.mxu1 %v1938_v12  ;;  %2267 = vmatpush.bf16.msra.mxu2 %v1938_v12 }
  0x38   : > { %437 = vst.msk [vmem:[#allocation2 + $0x10] sm:$0xf] %vm432_vm1, %v404_v17 }
  0x39   : > { %438 = vst.msk [vmem:[#allocation2 + $0x14] sm:$0xf] %vm432_vm1, %v405_v19 }
  0x3a   : > { %439 = vst.msk [vmem:[#allocation2 + $0x18] sm:$0xf] %vm432_vm1, %v406_v20  ;;  %v390_v20 = vld [vmem:[%s2501_s16 + $0xb0] sm:$0xff] }
  0x3b   : > { %440 = vst.msk [vmem:[#allocation2 + $0x1c] sm:$0xf] %vm432_vm1, %v407_v21  ;;  %v391_v21 = vld [vmem:[%s2501_s16 + $0xb8] sm:$0xff]  ;;  %v422_v23 = vpack.c.bf16 %v390_v20, %v390_v20 }
  0x3c   : > { %441 = vst.msk [vmem:[#allocation2 + $0x20] sm:$0xf] %vm432_vm1, %v408_v25  ;;  %v423_v24 = vpack.c.bf16 %v391_v21, %v391_v21  ;;  %v2143_v21 = vld [vmem:[%s3145_s5 + $0x38] sm:$0xff] }
  0x3d   : > { %442 = vst.msk [vmem:[#allocation2 + $0x24] sm:$0xf] %vm432_vm1, %v409_v26  ;;  %1307 = vmatpush.bf16.msrb.mxu3 %v2143_v21 }
  0x3e   : > { %v2101_v22 = vld [vmem:[#allocation2 + $0x8] sm:$0xff]  ;;  %443 = vst.msk [vmem:[#allocation2 + $0x28] sm:$0xf] %vm432_vm1, %v410_v30 }
  0x3f   : > { %1920 = vmatmul.msk.bf16.gmra.mxu0 %vm613_vm2, %v2101_v22  ;;  %444 = vst.msk [vmem:[#allocation2 + $0x2c] sm:$0xf] %vm432_vm1, %v411_v31  ;;  %v2667_v22 = vld [vmem:[%s3142_s2] ss:$0 sm:$0xff] }
  0x40   : > { %v2102_v27 = vld [vmem:[#allocation2 + $0x10] sm:$0xff]  ;;  %445 = vst.msk [vmem:[#allocation2 + $0x30] sm:$0xf] %vm432_vm1, %v412_v35  ;;  %v424_v35 = vpack.c.bf16 %v392_v33, %v392_v33 }
  0x41   : > { %446 = vst.msk [vmem:[#allocation2 + $0x34] sm:$0xf] %vm432_vm1, %v413_v36  ;;  %v425_v36 = vpack.c.bf16 %v393_v34, %v393_v34  ;;  %v2139_v34 = vld [vmem:[%s3145_s5 + $0x18] sm:$0xff] }
  0x42   : > { %v2103_v32 = vld [vmem:[#allocation2 + $0x18] sm:$0xff]  ;;  %447 = vst.msk [vmem:[#allocation2 + $0x38] sm:$0xf] %vm432_vm1, %v414_v43 }
  0x43   : > { %448 = vst.msk [vmem:[#allocation2 + $0x3c] sm:$0xf] %vm432_vm1, %v415_v44  ;;  %v395_v43 = vld [vmem:[%s2501_s16 + $0xd8] sm:$0xff]  ;;  %v426_v44 = vpack.c.bf16 %v394_v42, %v394_v42 }
  0x44   : > { %v2104_v37 = vld [vmem:[#allocation2 + $0x20] sm:$0xff]  ;;  %449 = vst.msk [vmem:[#allocation2 + $0x40] sm:$0xf] %vm432_vm1, %v416_v57  ;;  %v429_v57 = vpack.c.bf16 %v397_v55, %v397_v55  ;;  %v1987_v55 = vld [vmem:[%s3143_s3 + $0x68] sm:$0xf0] }
  0x45   : > { %450 = vst.msk [vmem:[#allocation2 + $0x44] sm:$0xf] %vm432_vm1, %v417_v58 }
  0x46   : > { %v2105_v45 = vld [vmem:[#allocation2 + $0x28] sm:$0xff]  ;;  %451 = vst.msk [vmem:[#allocation2 + $0x48] sm:$0xf] %vm432_vm1, %v418_v63 }
  0x47   : > { %452 = vst.msk [vmem:[#allocation2 + $0x4c] sm:$0xf] %vm432_vm1, %v419_v0 }
  0x48   : > { %v2106_v2 = vld [vmem:[#allocation2 + $0x30] sm:$0xff]  ;;  %453 = vst.msk [vmem:[#allocation2 + $0x50] sm:$0xf] %vm432_vm1, %v420_v15 }
  0x49   : > { %454 = vst.msk [vmem:[#allocation2 + $0x54] sm:$0xf] %vm432_vm1, %v421_v16 }
  0x4a   : > { %v2107_v17 = vld [vmem:[#allocation2 + $0x38] sm:$0xff]  ;;  %455 = vst.msk [vmem:[#allocation2 + $0x58] sm:$0xf] %vm432_vm1, %v422_v23 }
  0x4b   : > { %456 = vst.msk [vmem:[#allocation2 + $0x5c] sm:$0xf] %vm432_vm1, %v423_v24 }
  0x4c   : > { %v2108_v26 = vld [vmem:[#allocation2 + $0x40] sm:$0xff]  ;;  %457 = vst.msk [vmem:[#allocation2 + $0x60] sm:$0xf] %vm432_vm1, %v424_v35 }
  0x4d   : > { %458 = vst.msk [vmem:[#allocation2 + $0x64] sm:$0xf] %vm432_vm1, %v425_v36 }
  0x4e   : > { %v2109_v8 = vld [vmem:[#allocation2 + $0x48] sm:$0xff]  ;;  %459 = vst.msk [vmem:[#allocation2 + $0x68] sm:$0xf] %vm432_vm1, %v426_v44 }
  0x4f   : > { %1921 = vmatmul.msk.bf16.gmra.mxu0 %vm613_vm2, %v2102_v27  ;;  %1928 = vmatmul.msk.bf16.vlgmr.msra.gmra.mxu3 %vm613_vm2, %v2109_v8  ;;  %461 = vst.msk [vmem:[#allocation2 + $0x70] sm:$0xf] %vm432_vm1, %v428_v56  ;;  %v2137_v44 = vld [vmem:[%s3145_s5 + $0x8] sm:$0xff] }
  0x50   : > { %v2110_v18 = vld [vmem:[#allocation2 + $0x50] sm:$0xff]  ;;  %462 = vst.msk [vmem:[#allocation2 + $0x74] sm:$0xf] %vm432_vm1, %v429_v57  ;;  %v1990_v57 = vor.u32 %v2132_v54, %v1987_v55 }
  0x51   : > { %464 = vst.msk [vmem:[#allocation2 + $0x7c] sm:$0xf] %vm432_vm1, %v431_v5 }
  0x54   : > { %v2112_v38 = vld [vmem:[#allocation2 + $0x60] sm:$0xff] }
  0x57   : > { %v2114_v62 = vld [vmem:[#allocation2 + $0x70] sm:$0xff] }
  0x5f   : > { %1922 = vmatmul.msk.bf16.gmra.mxu0 %vm613_vm2, %v2103_v32  ;;  %1929 = vmatmul.msk.bf16.gmra.mxu3 %vm613_vm2, %v2110_v18  ;;  %v2111_v32 = vld [vmem:[#allocation2 + $0x58] sm:$0xff] }
  0x6f   : > { %1923 = vmatmul.msk.bf16.gmra.mxu0 %vm613_vm2, %v2104_v37  ;;  %1930 = vmatmul.msk.bf16.gmra.mxu3 %vm613_vm2, %v2111_v32 }
  0x7f   : > { %1924 = vmatmul.msk.bf16.gmra.mxu0 %vm613_vm2, %v2105_v45  ;;  %1931 = vmatmul.msk.bf16.gmra.mxu3 %vm613_vm2, %v2112_v38  ;;  %v427_v45 = vpack.c.bf16 %v395_v43, %v395_v43  ;;  %v2138_v38 = vld [vmem:[%s3145_s5 + $0x10] sm:$0xff] }
  0x81   : > { %460 = vst.msk [vmem:[#allocation2 + $0x6c] sm:$0xf] %vm432_vm1, %v427_v45  ;;  %v2136_v45 = vld [vmem:[%s3145_s5] sm:$0xff] }
  0x88   : > { %v2113_v50 = vld [vmem:[#allocation2 + $0x68] sm:$0xff] }
  0x8f   : > { %1925 = vmatmul.msk.bf16.gmra.mxu0 %vm613_vm2, %v2106_v2  ;;  %1932 = vmatmul.msk.bf16.gmra.mxu3 %vm613_vm2, %v2113_v50  ;;  %v398_v2 = vld [vmem:[%s2501_s16 + $0xf0] sm:$0xff]  ;;  %s324_s16 = sand.u32 1, %s2367_s10  }
  0x90   : > { %v430_v4 = vpack.c.bf16 %v398_v2, %v398_v2  ;;  %s1836_s25 = sshll.u32 %s324_s16, 7  ;;  %s1755_s22 = scalar_lea.sflag [#allocation4], %s324_s16 }
  0x91   : > { %s3046_s26 = scalar_lea.vmem [#allocation3], %s1836_s25 }
  0x92   : > { %463 = vst.msk [vmem:[#allocation2 + $0x78] sm:$0xf] %vm432_vm1, %v430_v4  ;;  %s1767_s17 = sshll.u32 %s3046_s26, 4  ;;  %s1768_s17 = int_to_ptr.vmem [resolvable:$true] %s1767_s17 }
  0x99   : > { %v2115_v10 = vld [vmem:[#allocation2 + $0x78] sm:$0xff] }
  0x9f   : > { %1926 = vmatmul.msk.bf16.gmra.mxu0 %vm613_vm2, %v2107_v17  ;;  %1933 = vmatmul.msk.bf16.gmra.mxu3 %vm613_vm2, %v2114_v62 }
  0xa3   : > { %v671_v19 = vpop.f32.mrf.mxu0 }
  0xa4   : > { %v672_v25 = vadd.f32 %v2667_v22, %v671_v19 }
  0xa6   : > { %v751_v29 = vmax.f32 %v672_v25, 0.0 }
  0xab   : > { %v673_v27 = vpop.f32.mrf.mxu0 }
  0xac   : > { %v674_v28 = vadd.f32 %v2667_v22, %v673_v27 }
  0xae   : > { %v752_v30 = vmax.f32 %v674_v28, 0.0  ;;  %v2141_v28 = vld [vmem:[%s3145_s5 + $0x28] sm:$0xff] }
  0xaf   : > { %1927 = vmatmul.msk.bf16.gmra.mxu0 %vm613_vm2, %v2108_v26  ;;  %1934 = vmatmul.msk.bf16.gmra.mxu3 %vm613_vm2, %v2115_v10  ;;  %v2142_v26 = vld [vmem:[%s3145_s5 + $0x30] sm:$0xff] }
  0xb0   : > { %v2674_v31 = vpack.c.bf16 %v752_v30, %v751_v29  ;;  %1308 = vmatpush.bf16.msrb.mxu3 %v2142_v26  ;;  %v2140_v29 = vld [vmem:[%s3145_s5 + $0x20] sm:$0xff] }
  0xb1   : > { %v2128_v26 = vld [vmem:[%s3143_s3 + $0x44] sm:$0xf] }
  0xb2   : > { %909 = vmatmul.bf16.vlgmr.msra.gmra.mxu1 %v2674_v31 }
  0xb4   : > { %1309 = vmatpush.bf16.msrb.mxu3 %v2141_v28 }
  0xb8   : > { %1310 = vmatpush.bf16.msrb.mxu3 %v2140_v29 }
  0xbc   : > { %v676_v37 = vpop.f32.mrf.mxu0  ;;  %1311 = vmatpush.bf16.msrb.mxu3 %v2139_v34 }
  0xbd   : > { %v677_v39 = vadd.f32 %v2667_v22, %v676_v37 }
  0xbf   : > { %v753_v46 = vmax.f32 %v677_v39, 0.0  ;;  %v2134_v39 = vld [vmem:[%s3143_s3 + $0x74] sm:$0xf] }
  0xc0   : > { %1312 = vmatpush.bf16.msrb.mxu3 %v2138_v38 }
  0xc4   : > { %v678_v40 = vpop.f32.mrf.mxu0  ;;  %1313 = vmatpush.bf16.msrb.mxu3 %v2137_v44 }
  0xc5   : > { %v679_v41 = vadd.f32 %v2667_v22, %v678_v40  ;;  %v1995_v40 = vld [vmem:[%s3143_s3 + $0x78] sm:$0xf0] }
  0xc6   : > { %v1998_v43 = vor.u32 %v2134_v39, %v1995_v40 }
  0xc7   : > { %v754_v47 = vmax.f32 %v679_v41, 0.0 }
  0xc8   : > { %990 = vmatpush.bf16.msrb.mxu2 %v1998_v43  ;;  %1314 = vmatpush.bf16.msrb.mxu3 %v2136_v45  ;;  %v2126_v45 = vld [vmem:[%s3143_s3 + $0x34] sm:$0xf] }
  0xc9   : > { %v2688_v48 = vpack.c.bf16 %v754_v47, %v753_v46 }
  0xcb   : > { %914 = vmatmul.bf16.gmra.mxu1 %v2688_v48 }
  0xcc   : > { %v681_v49 = vpop.f32.mrf.mxu0  ;;  %991 = vmatpush.bf16.msrb.mxu2 %v1990_v57 }
  0xcd   : > { %v682_v51 = vadd.f32 %v2667_v22, %v681_v49 }
  0xcf   : > { %v755_v58 = vmax.f32 %v682_v51, 0.0 }
  0xd2   : > { %v716_v42 = vpop.f32.mrf.mxu3 }
  0xd4   : > { %v683_v52 = vpop.f32.mrf.mxu0 }
  0xd5   : > { %v684_v53 = vadd.f32 %v2667_v22, %v683_v52 }
  0xd7   : > { %v756_v59 = vmax.f32 %v684_v53, 0.0 }
  0xd9   : > { %v2698_v60 = vpack.c.bf16 %v756_v59, %v755_v58  ;;  %v2772_v58 = vld [vmem:[%s3144_s4] sm:$0x3] }
  0xda   : > { %v718_v50 = vpop.f32.mrf.mxu3  ;;  %v2775_v62 = vperm.slane %v2772_v58, 0 }
  0xdb   : > { %919 = vmatmul.bf16.gmra.mxu1 %v2698_v60 }
  0xdc   : > { %v686_v61 = vpop.f32.mrf.mxu0 }
  0xdd   : > { %v687_v63 = vadd.f32 %v2667_v22, %v686_v61 }
  0xdf   : > { %v757_v6 = vmax.f32 %v687_v63, 0.0 }
  0xe2   : > { %v721_v61 = vpop.f32.mrf.mxu3 }
  0xe4   : > { %v688_v0 = vpop.f32.mrf.mxu0 }
  0xe5   : > { %v689_v1 = vadd.f32 %v2667_v22, %v688_v0 }
  0xe7   : > { %v758_v7 = vmax.f32 %v689_v1, 0.0 }
  0xe9   : > { %v2708_v8 = vpack.c.bf16 %v758_v7, %v757_v6 }
  0xeb   : > { %924 = vmatmul.bf16.gmra.mxu1 %v2708_v8 }
  0xec   : > { %v691_v9 = vpop.f32.mrf.mxu0 }
  0xed   : > { %v692_v11 = vadd.f32 %v2667_v22, %v691_v9 }
  0xef   : > { %v759_v14 = vmax.f32 %v692_v11, 0.0  ;;  %v723_v11 = vpop.f32.mrf.mxu3 }
  0xf0   : > { %v724_v34 = vadd.f32 %v2667_v22, %v723_v11 }
  0xf2   : > { %v772_v40 = vmax.f32 %v724_v34, 0.0 }
  0xf4   : > { %v693_v12 = vpop.f32.mrf.mxu0 }
  0xf5   : > { %v694_v13 = vadd.f32 %v2667_v22, %v693_v12  ;;  %v2130_v12 = vld [vmem:[%s3143_s3 + $0x54] sm:$0xf] }
  0xf7   : > { %v760_v15 = vmax.f32 %v694_v13, 0.0  ;;  %v1979_v13 = vld [vmem:[%s3143_s3 + $0x58] sm:$0xf0] }
  0xf9   : > { %v2715_v16 = vpack.c.bf16 %v760_v15, %v759_v14  ;;  %v1982_v15 = vor.u32 %v2130_v12, %v1979_v13 }
  0xfb   : > { %929 = vmatmul.bf16.gmra.mxu1 %v2715_v16  ;;  %992 = vmatpush.bf16.msrb.mxu2 %v1982_v15 }
  0xfc   : > { %v696_v17 = vpop.f32.mrf.mxu0 }
  0xfd   : > { %v697_v18 = vadd.f32 %v2667_v22, %v696_v17  ;;  %v717_v17 = vadd.f32 %v2667_v22, %v716_v42 }
  0xff   : > { %v761_v23 = vmax.f32 %v697_v18, 0.0  ;;  %v719_v18 = vadd.f32 %v2667_v22, %v718_v50 }
 0x101   : > { %v770_v21 = vmax.f32 %v719_v18, 0.0 }
 0x104   : > { %v698_v19 = vpop.f32.mrf.mxu0 }
 0x105   : > { %v699_v20 = vadd.f32 %v2667_v22, %v698_v19  ;;  %v726_v19 = vpop.f32.mrf.mxu3 }
 0x107   : > { %v762_v24 = vmax.f32 %v699_v20, 0.0  ;;  %v769_v20 = vmax.f32 %v717_v17, 0.0 }
 0x109   : > { %v2723_v25 = vpack.c.bf16 %v762_v24, %v761_v23  ;;  %v2792_v24 = vpack.c.bf16 %v770_v21, %v769_v20 }
 0x10b   : > { %934 = vmatmul.bf16.gmra.mxu1 %v2723_v25 }
 0x10c   : > { %v701_v27 = vpop.f32.mrf.mxu0 }
 0x10d   : > { %v702_v30 = vadd.f32 %v2667_v22, %v701_v27  ;;  %v1971_v27 = vld [vmem:[%s3143_s3 + $0x48] sm:$0xf0]  ;;  %v728_v29 = vpop.f32.mrf.mxu3 }
 0x10e   : > { %v1974_v28 = vor.u32 %v2128_v26, %v1971_v27  ;;  %v1947_v26 = vld [vmem:[%s3143_s3 + $0x18] sm:$0xf0] }
 0x10f   : > { %v763_v35 = vmax.f32 %v702_v30, 0.0 }
 0x110   : > { %993 = vmatpush.bf16.msrb.mxu2 %v1974_v28 }
 0x114   : > { %v703_v32 = vpop.f32.mrf.mxu0 }
 0x115   : > { %v704_v33 = vadd.f32 %v2667_v22, %v703_v32  ;;  %v731_v43 = vpop.f32.mrf.mxu3 }
 0x117   : > { %v764_v36 = vmax.f32 %v704_v33, 0.0  ;;  %v722_v33 = vadd.f32 %v2667_v22, %v721_v61 }
 0x119   : > { %v2740_v37 = vpack.c.bf16 %v764_v36, %v763_v35  ;;  %v771_v39 = vmax.f32 %v722_v33, 0.0 }
 0x11b   : > { %939 = vmatmul.bf16.gmra.mxu1 %v2740_v37  ;;  %v2805_v44 = vpack.c.bf16 %v772_v40, %v771_v39 }
 0x11c   : > { %v706_v41 = vpop.f32.mrf.mxu0 }
 0x11d   : > { %v707_v46 = vadd.f32 %v2667_v22, %v706_v41  ;;  %v733_v55 = vpop.f32.mrf.mxu3 }
 0x11e   : > { %v734_v11 = vadd.f32 %v2667_v22, %v733_v55 }
 0x11f   : > { %v765_v51 = vmax.f32 %v707_v46, 0.0  ;;  %v1963_v46 = vld [vmem:[%s3143_s3 + $0x38] sm:$0xf0] }
 0x120   : > { %v776_v17 = vmax.f32 %v734_v11, 0.0 }
 0x124   : > { %v708_v47 = vpop.f32.mrf.mxu0 }
 0x125   : > { %v709_v49 = vadd.f32 %v2667_v22, %v708_v47  ;;  %v1966_v47 = vor.u32 %v2126_v45, %v1963_v46  ;;  %v2120_v45 = vld [vmem:[%s3143_s3 + $0x4] sm:$0xf]  ;;  %v1939_v46 = vld [vmem:[%s3143_s3 + $0x8] sm:$0xf0] }
 0x127   : > { %v766_v52 = vmax.f32 %v709_v49, 0.0  ;;  %994 = vmatpush.bf16.msrb.mxu2 %v1966_v47  ;;  %v1942_v47 = vor.u32 %v2120_v45, %v1939_v46 }
 0x129   : > { %v2760_v53 = vpack.c.bf16 %v766_v52, %v765_v51  ;;  %v727_v51 = vadd.f32 %v2667_v22, %v726_v19  ;;  %v729_v52 = vadd.f32 %v2667_v22, %v728_v29 }
 0x12b   : > { %944 = vmatmul.bf16.gmra.mxu1 %v2760_v53  ;;  %v774_v61 = vmax.f32 %v729_v52, 0.0 }
 0x12c   : > { %v711_v56 = vpop.f32.mrf.mxu0 }
 0x12d   : > { %v712_v63 = vadd.f32 %v2667_v22, %v711_v56 }
 0x12f   : > { %v910_v59 = vpop.f32.mrf.mxu1  ;;  %v767_v3 = vmax.f32 %v712_v63, 0.0 }
 0x130   : > { %v911_v2 = vadd.f32 %v910_v59, %v2775_v62  ;;  %v773_v59 = vmax.f32 %v727_v51, 0.0 }
 0x132   : > { %v1079_v9 = vmax.f32 %v911_v2, 0.0  ;;  %v2124_v2 = vld [vmem:[%s3143_s3 + $0x24] sm:$0xf] }
 0x134   : > { %v713_v0 = vpop.f32.mrf.mxu0 }
 0x135   : > { %v714_v1 = vadd.f32 %v2667_v22, %v713_v0 }
 0x137   : > { %v768_v4 = vmax.f32 %v714_v1, 0.0  ;;  %v912_v5 = vpop.f32.mrf.mxu1  ;;  %v2818_v1 = vpack.c.bf16 %v774_v61, %v773_v59 }
 0x138   : > { %v913_v6 = vadd.f32 %v912_v5, %v2775_v62 }
 0x139   : > { %v2781_v7 = vpack.c.bf16 %v768_v4, %v767_v3  ;;  %v1955_v3 = vld [vmem:[%s3143_s3 + $0x28] sm:$0xf0]  ;;  %v736_v4 = vpop.f32.mrf.mxu3 }
 0x13a   : > { %v1081_v10 = vmax.f32 %v913_v6, 0.0  ;;  %v1958_v5 = vor.u32 %v2124_v2, %v1955_v3  ;;  %v2151_v3 = vld [vmem:[%s3145_s5 + $0x78] sm:$0xff] }
 0x13b   : > { %949 = vmatmul.bf16.vlgmr.msra.gmra.mxu2 %v2781_v7  ;;  %1396 = vmatpush.bf16.msrb.mxu0 %v2151_v3 }
 0x13c   : > { %v1143_v14 = vpack.c.bf16 %v1081_v10, %v1079_v9  ;;  %995 = vmatpush.bf16.msrb.mxu2 %v1958_v5  ;;  %v732_v10 = vadd.f32 %v2667_v22, %v731_v43 }
 0x13e   : > { %1315 = vmatmul.bf16.vlgmr.msrb.gmra.mxu3 %v1143_v14  ;;  %v775_v15 = vmax.f32 %v732_v10, 0.0 }
 0x140   : > { %v2831_v21 = vpack.c.bf16 %v776_v17, %v775_v15 }
 0x141   : > { %v738_v19 = vpop.f32.mrf.mxu3 }
 0x142   : > { %v739_v33 = vadd.f32 %v2667_v22, %v738_v19 }
 0x144   : > { %v778_v39 = vmax.f32 %v739_v33, 0.0 }
 0x148   : > { %v915_v23 = vpop.f32.mrf.mxu1 }
 0x149   : > { %v916_v30 = vadd.f32 %v915_v23, %v2775_v62  ;;  %v2122_v23 = vld [vmem:[%s3143_s3 + $0x14] sm:$0xf] }
 0x14a   : > { %v1950_v27 = vor.u32 %v2122_v23, %v1947_v26 }
 0x14b   : > { %954 = vmatmul.bf16.gmra.mxu2 %v2792_v24  ;;  %v1083_v36 = vmax.f32 %v916_v30, 0.0  ;;  %v741_v30 = vpop.f32.mrf.mxu3 }
 0x14c   : > { %996 = vmatpush.bf16.msrb.mxu2 %v1950_v27  ;;  %v742_v51 = vadd.f32 %v2667_v22, %v741_v30 }
 0x14e   : > { %v779_v59 = vmax.f32 %v742_v51, 0.0 }
 0x150   : > { %v917_v32 = vpop.f32.mrf.mxu1  ;;  %997 = vmatpush.bf16.msrb.mxu2 %v1942_v47 }
 0x151   : > { %v918_v35 = vadd.f32 %v917_v32, %v2775_v62  ;;  %v737_v32 = vadd.f32 %v2667_v22, %v736_v4 }
 0x153   : > { %v1085_v38 = vmax.f32 %v918_v35, 0.0  ;;  %v743_v43 = vpop.f32.mrf.mxu3 }
 0x154   : > { %v744_v52 = vadd.f32 %v2667_v22, %v743_v43 }
 0x155   : > { %v1145_v41 = vpack.c.bf16 %v1085_v38, %v1083_v36  ;;  %v777_v38 = vmax.f32 %v737_v32, 0.0  ;;  %v2149_v32 = vld [vmem:[%s3145_s5 + $0x68] sm:$0xff] }
 0x156   : > { %v780_v61 = vmax.f32 %v744_v52, 0.0 }
 0x157   : > { %1320 = vmatmul.bf16.gmra.mxu3 %v1145_v41 }
 0x158   : > { %v920_v42 = vpop.f32.mrf.mxu1  ;;  %v2857_v2 = vpack.c.bf16 %v780_v61, %v779_v59 }
 0x159   : > { %v921_v49 = vadd.f32 %v920_v42, %v2775_v62  ;;  %v2844_v42 = vpack.c.bf16 %v778_v39, %v777_v38 }
 0x15b   : > { %959 = vmatmul.bf16.gmra.mxu2 %v2805_v44  ;;  %v1087_v56 = vmax.f32 %v921_v49, 0.0 }
 0x160   : > { %v922_v50 = vpop.f32.mrf.mxu1 }
 0x161   : > { %v923_v54 = vadd.f32 %v922_v50, %v2775_v62 }
 0x163   : > { %v1089_v57 = vmax.f32 %v923_v54, 0.0 }
 0x165   : > { %v1147_v63 = vpack.c.bf16 %v1089_v57, %v1087_v56  ;;  %v746_v57 = vpop.f32.mrf.mxu3 }
 0x167   : > { %1325 = vmatmul.bf16.gmra.mxu3 %v1147_v63 }
 0x168   : > { %v925_v0 = vpop.f32.mrf.mxu1 }
 0x169   : > { %v926_v6 = vadd.f32 %v925_v0, %v2775_v62 }
 0x16b   : > { %964 = vmatmul.bf16.gmra.mxu2 %v2818_v1  ;;  %v1091_v13 = vmax.f32 %v926_v6, 0.0 }
 0x16d   : > { %v748_v4 = vpop.f32.mrf.mxu3 }
 0x16e   : > { %v749_v10 = vadd.f32 %v2667_v22, %v748_v4 }
 0x170   : > { %v927_v9 = vpop.f32.mrf.mxu1  ;;  %v782_v15 = vmax.f32 %v749_v10, 0.0 }
 0x171   : > { %v928_v12 = vadd.f32 %v927_v9, %v2775_v62  ;;  %v747_v9 = vadd.f32 %v2667_v22, %v746_v57  ;;  %v2150_v22 = vld [vmem:[%s3145_s5 + $0x70] sm:$0xff] }
 0x172   : > { %1397 = vmatpush.bf16.msrb.mxu0 %v2150_v22 }
 0x173   : > { %v1093_v14 = vmax.f32 %v928_v12, 0.0 }
 0x175   : > { %v1149_v18 = vpack.c.bf16 %v1093_v14, %v1091_v13  ;;  %v781_v14 = vmax.f32 %v747_v9, 0.0 }
 0x176   : > { %1398 = vmatpush.bf16.msrb.mxu0 %v2149_v32 }
 0x177   : > { %1330 = vmatmul.bf16.gmra.mxu3 %v1149_v18  ;;  %v2867_v19 = vpack.c.bf16 %v782_v15, %v781_v14  ;;  %v2145_v15 = vld [vmem:[%s3145_s5 + $0x48] sm:$0xff] }
 0x178   : > { %v930_v20 = vpop.f32.mrf.mxu1 }
 0x179   : > { %v931_v28 = vadd.f32 %v930_v20, %v2775_v62 }
 0x17b   : > { %969 = vmatmul.bf16.gmra.mxu2 %v2831_v21  ;;  %v1095_v35 = vmax.f32 %v931_v28, 0.0 }
 0x180   : > { %v932_v29 = vpop.f32.mrf.mxu1 }
 0x181   : > { %v933_v34 = vadd.f32 %v932_v29, %v2775_v62 }
 0x183   : > { %v1097_v36 = vmax.f32 %v933_v34, 0.0 }
 0x185   : > { %v1151_v40 = vpack.c.bf16 %v1097_v36, %v1095_v35 }
 0x187   : > { %1335 = vmatmul.bf16.gmra.mxu3 %v1151_v40 }
 0x188   : > { %v935_v41 = vpop.f32.mrf.mxu1 }
 0x189   : > { %v936_v49 = vadd.f32 %v935_v41, %v2775_v62 }
 0x18b   : > { %974 = vmatmul.bf16.gmra.mxu2 %v2844_v42  ;;  %v1099_v55 = vmax.f32 %v936_v49, 0.0 }
 0x190   : > { %v937_v50 = vpop.f32.mrf.mxu1 }
 0x191   : > { %v938_v54 = vadd.f32 %v937_v50, %v2775_v62  ;;  %v2147_v50 = vld [vmem:[%s3145_s5 + $0x58] sm:$0xff] }
 0x193   : > { %v1101_v56 = vmax.f32 %v938_v54, 0.0 }
 0x195   : > { %v1153_v63 = vpack.c.bf16 %v1101_v56, %v1099_v55 }
 0x197   : > { %1340 = vmatmul.bf16.gmra.mxu3 %v1153_v63 }
 0x198   : > { %v940_v0 = vpop.f32.mrf.mxu1 }
 0x199   : > { %v941_v5 = vadd.f32 %v940_v0, %v2775_v62 }
 0x19b   : > { %979 = vmatmul.bf16.gmra.mxu2 %v2857_v2  ;;  %v1103_v12 = vmax.f32 %v941_v5, 0.0  ;;  %v2146_v5 = vld [vmem:[%s3145_s5 + $0x50] sm:$0xff] }
 0x1a0   : > { %v942_v6 = vpop.f32.mrf.mxu1 }
 0x1a1   : > { %v943_v11 = vadd.f32 %v942_v6, %v2775_v62 }
 0x1a3   : > { %v1105_v13 = vmax.f32 %v943_v11, 0.0 }
 0x1a5   : > { %v1155_v17 = vpack.c.bf16 %v1105_v13, %v1103_v12 }
 0x1a7   : > { %1345 = vmatmul.bf16.gmra.mxu3 %v1155_v17 }
 0x1a8   : > { %v945_v18 = vpop.f32.mrf.mxu1 }
 0x1a9   : > { %v946_v20 = vadd.f32 %v945_v18, %v2775_v62 }
 0x1ab   : > { %984 = vmatmul.bf16.gmra.mxu2 %v2867_v19  ;;  %v1107_v27 = vmax.f32 %v946_v20, 0.0 }
 0x1b0   : > { %v947_v23 = vpop.f32.mrf.mxu1 }
 0x1b1   : > { %v948_v26 = vadd.f32 %v947_v23, %v2775_v62 }
 0x1b3   : > { %v1109_v28 = vmax.f32 %v948_v26, 0.0 }
 0x1b5   : > { %v1157_v29 = vpack.c.bf16 %v1109_v28, %v1107_v27 }
 0x1b7   : > { %1350 = vmatmul.bf16.gmra.mxu3 %v1157_v29 }
 0x1bb   : > { %998 = vmatmul.bf16.vlgmr.msrb.gmra.mxu2 %v2674_v31  ;;  %v2148_v31 = vld [vmem:[%s3145_s5 + $0x60] sm:$0xff] }
 0x1bc   : > { %1399 = vmatpush.bf16.msrb.mxu0 %v2148_v31 }
 0x1be   : > { %v950_v30 = vpop.f32.mrf.mxu2 }
 0x1bf   : > { %v951_v33 = vadd.f32 %v950_v30, %v2775_v62 }
 0x1c0   : > { %1400 = vmatpush.bf16.msrb.mxu0 %v2147_v50 }
 0x1c1   : > { %v1111_v36 = vmax.f32 %v951_v33, 0.0  ;;  %v2895_v63 = vpop.f32.mrf.mxu3 }
 0x1c4   : > { %1401 = vmatpush.bf16.msrb.mxu0 %v2146_v5 }
 0x1c6   : > { %v952_v34 = vpop.f32.mrf.mxu2 }
 0x1c7   : > { %v953_v35 = vadd.f32 %v952_v34, %v2775_v62 }
 0x1c8   : > { %1402 = vmatpush.bf16.msrb.mxu0 %v2145_v15 }
 0x1c9   : > { %v1113_v38 = vmax.f32 %v953_v35, 0.0  ;;  %v2902_v9 = vpop.f32.mrf.mxu3 }
 0x1cb   : > { %1003 = vmatmul.bf16.gmra.mxu2 %v2688_v48  ;;  %v1159_v39 = vpack.c.bf16 %v1113_v38, %v1111_v36 }
 0x1cd   : > { %1355 = vmatmul.bf16.gmra.mxu3 %v1159_v39 }
 0x1ce   : > { %v955_v40 = vpop.f32.mrf.mxu2 }
 0x1cf   : > { %v956_v41 = vadd.f32 %v955_v40, %v2775_v62 }
 0x1d1   : > { %v1115_v46 = vmax.f32 %v956_v41, 0.0 }
 0x1d6   : > { %v957_v43 = vpop.f32.mrf.mxu2 }
 0x1d7   : > { %v958_v45 = vadd.f32 %v957_v43, %v2775_v62 }
 0x1d9   : > { %v1117_v47 = vmax.f32 %v958_v45, 0.0 }
 0x1da   : > { %v2909_v17 = vpop.f32.mrf.mxu3 }
 0x1db   : > { %1008 = vmatmul.bf16.gmra.mxu2 %v2698_v60  ;;  %v1161_v49 = vpack.c.bf16 %v1117_v47, %v1115_v46 }
 0x1dd   : > { %1360 = vmatmul.bf16.gmra.mxu3 %v1161_v49  ;;  %v2159_v49 = vld [vmem:[%s3147_s7 + $0x38] sm:$0xff] }
 0x1de   : > { %v960_v48 = vpop.f32.mrf.mxu2  ;;  %1601 = vmatpush.bf16.msrb.mxu1 %v2159_v49 }
 0x1df   : > { %v961_v51 = vadd.f32 %v960_v48, %v2775_v62 }
 0x1e1   : > { %v1119_v55 = vmax.f32 %v961_v51, 0.0  ;;  %v2938_v51 = vperm.slane %v2772_v58, 1 }
 0x1e2   : > { %v2912_v20 = vpop.f32.mrf.mxu3 }
 0x1e6   : > { %v962_v52 = vpop.f32.mrf.mxu2 }
 0x1e7   : > { %v963_v54 = vadd.f32 %v962_v52, %v2775_v62 }
 0x1e9   : > { %v1121_v56 = vmax.f32 %v963_v54, 0.0 }
 0x1ea   : > { %v2920_v32 = vpop.f32.mrf.mxu3 }
 0x1eb   : > { %1013 = vmatmul.bf16.gmra.mxu2 %v2708_v8  ;;  %v1163_v57 = vpack.c.bf16 %v1121_v56, %v1119_v55 }
 0x1ed   : > { %1365 = vmatmul.bf16.gmra.mxu3 %v1163_v57 }
 0x1ee   : > { %v965_v60 = vpop.f32.mrf.mxu2 }
 0x1ef   : > { %v966_v59 = vadd.f32 %v965_v60, %v2775_v62 }
 0x1f1   : > { %v1123_v3 = vmax.f32 %v966_v59, 0.0 }
 0x1f2   : > { %v2924_v36 = vpop.f32.mrf.mxu3 }
 0x1f6   : > { %v967_v61 = vpop.f32.mrf.mxu2 }
 0x1f7   : > { %v968_v0 = vadd.f32 %v967_v61, %v2775_v62 }
 0x1f9   : > { %v1125_v4 = vmax.f32 %v968_v0, 0.0 }
 0x1fa   : > { %v2927_v31 = vpop.f32.mrf.mxu3 }
 0x1fb   : > { %1018 = vmatmul.bf16.gmra.mxu2 %v2715_v16  ;;  %v1165_v6 = vpack.c.bf16 %v1125_v4, %v1123_v3  ;;  %v2157_v4 = vld [vmem:[%s3147_s7 + $0x28] sm:$0xff] }
 0x1fd   : > { %1370 = vmatmul.bf16.gmra.mxu3 %v1165_v6 }
 0x1fe   : > { %v970_v8 = vpop.f32.mrf.mxu2 }
 0x1ff   : > { %v971_v10 = vadd.f32 %v970_v8, %v2775_v62 }
 0x201   : > { %v1127_v13 = vmax.f32 %v971_v10, 0.0 }
 0x206   : > { %v972_v11 = vpop.f32.mrf.mxu2 }
 0x207   : > { %v973_v12 = vadd.f32 %v972_v11, %v2775_v62 }
 0x209   : > { %v1129_v14 = vmax.f32 %v973_v12, 0.0 }
 0x20b   : > { %1023 = vmatmul.bf16.gmra.mxu2 %v2723_v25  ;;  %v1167_v16 = vpack.c.bf16 %v1129_v14, %v1127_v13  ;;  %v2144_v25 = vld [vmem:[%s3145_s5 + $0x40] sm:$0xff] }
 0x20c   : > { %1403 = vmatpush.bf16.msrb.mxu0 %v2144_v25  ;;  %v2156_v14 = vld [vmem:[%s3147_s7 + $0x20] sm:$0xff] }
 0x20d   : > { %1375 = vmatmul.bf16.gmra.mxu3 %v1167_v16 }
 0x20e   : > { %v975_v18 = vpop.f32.mrf.mxu2 }
 0x20f   : > { %v976_v23 = vadd.f32 %v975_v18, %v2775_v62 }
 0x211   : > { %v1131_v27 = vmax.f32 %v976_v23, 0.0 }
 0x216   : > { %v977_v26 = vpop.f32.mrf.mxu2 }
 0x217   : > { %v978_v22 = vadd.f32 %v977_v26, %v2775_v62 }
 0x219   : > { %v1133_v28 = vmax.f32 %v978_v22, 0.0 }
 0x21b   : > { %1028 = vmatmul.bf16.gmra.mxu2 %v2740_v37  ;;  %v1169_v29 = vpack.c.bf16 %v1133_v28, %v1131_v27 }
 0x21d   : > { %1380 = vmatmul.bf16.gmra.mxu3 %v1169_v29 }
 0x21e   : > { %v980_v30 = vpop.f32.mrf.mxu2 }
 0x21f   : > { %v981_v33 = vadd.f32 %v980_v30, %v2775_v62 }
 0x221   : > { %v1135_v38 = vmax.f32 %v981_v33, 0.0 }
 0x226   : > { %v982_v34 = vpop.f32.mrf.mxu2 }
 0x227   : > { %v983_v35 = vadd.f32 %v982_v34, %v2775_v62 }
 0x229   : > { %v1137_v39 = vmax.f32 %v983_v35, 0.0 }
 0x22b   : > { %1033 = vmatmul.bf16.gmra.mxu2 %v2760_v53  ;;  %v1171_v37 = vpack.c.bf16 %v1137_v39, %v1135_v38  ;;  %v2935_v53 = vpop.f32.mrf.mxu3 }
 0x22d   : > { %1385 = vmatmul.bf16.gmra.mxu3 %v1171_v37 }
 0x22e   : > { %v985_v40 = vpop.f32.mrf.mxu2 }
 0x22f   : > { %v986_v41 = vadd.f32 %v985_v40, %v2775_v62 }
 0x231   : > { %v1139_v46 = vmax.f32 %v986_v41, 0.0 }
 0x236   : > { %v987_v43 = vpop.f32.mrf.mxu2 }
 0x237   : > { %v988_v45 = vadd.f32 %v987_v43, %v2775_v62 }
 0x239   : > { %v1141_v47 = vmax.f32 %v988_v45, 0.0 }
 0x23b   : > { %1038 = vmatmul.bf16.gmra.mxu2 %v2781_v7  ;;  %v1173_v48 = vpack.c.bf16 %v1141_v47, %v1139_v46  ;;  %v2158_v7 = vld [vmem:[%s3147_s7 + $0x30] sm:$0xff] }
 0x23c   : > { %1602 = vmatpush.bf16.msrb.mxu1 %v2158_v7 }
 0x23d   : > { %1390 = vmatmul.bf16.gmra.mxu3 %v1173_v48 }
 0x23e   : > { %v999_v50 = vpop.f32.mrf.mxu2 }
 0x23f   : > { %v1000_v52 = vadd.f32 %v999_v50, %v2938_v51 }
 0x240   : > { %1603 = vmatpush.bf16.msrb.mxu1 %v2157_v4 }
 0x241   : > { %v1080_v55 = vmax.f32 %v1000_v52, 0.0 }
 0x244   : > { %1604 = vmatpush.bf16.msrb.mxu1 %v2156_v14 }
 0x246   : > { %v1001_v62 = vpop.f32.mrf.mxu2 }
 0x247   : > { %v1002_v54 = vadd.f32 %v1001_v62, %v2938_v51 }
 0x249   : > { %v1082_v56 = vmax.f32 %v1002_v54, 0.0 }
 0x24b   : > { %1043 = vmatmul.bf16.gmra.mxu2 %v2792_v24  ;;  %v1144_v57 = vpack.c.bf16 %v1082_v56, %v1080_v55 }
 0x24d   : > { %1404 = vmatmul.bf16.vlgmr.msrb.gmra.mxu0 %v1144_v57 }
 0x24e   : > { %v1004_v60 = vpop.f32.mrf.mxu2 }
 0x24f   : > { %v1005_v58 = vadd.f32 %v1004_v60, %v2938_v51 }
 0x251   : > { %v1084_v0 = vmax.f32 %v1005_v58, 0.0 }
 0x256   : > { %v1006_v59 = vpop.f32.mrf.mxu2 }
 0x257   : > { %v1007_v61 = vadd.f32 %v1006_v59, %v2938_v51 }
 0x259   : > { %v1086_v3 = vmax.f32 %v1007_v61, 0.0 }
 0x25b   : > { %1048 = vmatmul.bf16.gmra.mxu2 %v2805_v44  ;;  %v1146_v5 = vpack.c.bf16 %v1086_v3, %v1084_v0 }
 0x25d   : > { %1409 = vmatmul.bf16.gmra.mxu0 %v1146_v5  ;;  %v2989_v5 = vld [vmem:[%s3146_s6] ss:$0 sm:$0xff] }
 0x25e   : > { %v1009_v24 = vpop.f32.mrf.mxu2 }
 0x25f   : > { %v1010_v6 = vadd.f32 %v1009_v24, %v2938_v51 }
 0x261   : > { %v1088_v11 = vmax.f32 %v1010_v6, 0.0 }
 0x266   : > { %v1011_v8 = vpop.f32.mrf.mxu2 }
 0x267   : > { %v1012_v10 = vadd.f32 %v1011_v8, %v2938_v51  ;;  %v1317_v8 = vadd.f32 %v2989_v5, %v2895_v63 }
 0x269   : > { %v1090_v12 = vmax.f32 %v1012_v10, 0.0  ;;  %v1319_v10 = vadd.f32 %v2989_v5, %v2902_v9 }
 0x26b   : > { %1053 = vmatmul.bf16.gmra.mxu2 %v2818_v1  ;;  %v1148_v13 = vpack.c.bf16 %v1090_v12, %v1088_v11  ;;  %v2155_v1 = vld [vmem:[%s3147_s7 + $0x18] sm:$0xff] }
 0x26c   : > { %1605 = vmatpush.bf16.msrb.mxu1 %v2155_v1  ;;  %v2997_v1 = vpop.f32.mrf.mxu3 }
 0x26d   : > { %1414 = vmatmul.bf16.gmra.mxu0 %v1148_v13 }
 0x26e   : > { %v1014_v44 = vpop.f32.mrf.mxu2 }
 0x26f   : > { %v1015_v15 = vadd.f32 %v1014_v44, %v2938_v51 }
 0x271   : > { %v1092_v23 = vmax.f32 %v1015_v15, 0.0 }
 0x276   : > { %v1016_v16 = vpop.f32.mrf.mxu2 }
 0x277   : > { %v1017_v18 = vadd.f32 %v1016_v16, %v2938_v51 }
 0x279   : > { %v1094_v26 = vmax.f32 %v1017_v18, 0.0 }
 0x27b   : > { %1058 = vmatmul.bf16.gmra.mxu2 %v2831_v21  ;;  %v1150_v22 = vpack.c.bf16 %v1094_v26, %v1092_v23  ;;  %v2154_v21 = vld [vmem:[%s3147_s7 + $0x10] sm:$0xff] }
 0x27c   : > { %1606 = vmatpush.bf16.msrb.mxu1 %v2154_v21 }
 0x27d   : > { %1419 = vmatmul.bf16.gmra.mxu0 %v1150_v22 }
 0x27e   : > { %v1019_v27 = vpop.f32.mrf.mxu2 }
 0x27f   : > { %v1020_v28 = vadd.f32 %v1019_v27, %v2938_v51 }
 0x281   : > { %v1096_v30 = vmax.f32 %v1020_v28, 0.0  ;;  %v1322_v28 = vadd.f32 %v2989_v5, %v2909_v17 }
 0x286   : > { %v1021_v29 = vpop.f32.mrf.mxu2 }
 0x287   : > { %v1022_v25 = vadd.f32 %v1021_v29, %v2938_v51  ;;  %v1324_v29 = vadd.f32 %v2989_v5, %v2912_v20 }
 0x289   : > { %v1098_v33 = vmax.f32 %v1022_v25, 0.0 }
 0x28b   : > { %v1152_v34 = vpack.c.bf16 %v1098_v33, %v1096_v30  ;;  %1063 = vmatmul.bf16.gmra.mxu2 %v2844_v42  ;;  %v2153_v42 = vld [vmem:[%s3147_s7 + $0x8] sm:$0xff] }
 0x28c   : > { %1607 = vmatpush.bf16.msrb.mxu1 %v2153_v42 }
 0x28d   : > { %1424 = vmatmul.bf16.gmra.mxu0 %v1152_v34  ;;  %v1338_v34 = vpop.f32.mrf.mxu3 }
 0x28e   : > { %v1024_v35 = vpop.f32.mrf.mxu2 }
 0x28f   : > { %v1025_v38 = vadd.f32 %v1024_v35, %v2938_v51 }
 0x291   : > { %v1100_v40 = vmax.f32 %v1025_v38, 0.0 }
 0x296   : > { %v1026_v39 = vpop.f32.mrf.mxu2 }
 0x297   : > { %v1027_v37 = vadd.f32 %v1026_v39, %v2938_v51 }
 0x299   : > { %v1102_v41 = vmax.f32 %v1027_v37, 0.0 }
 0x29b   : > { %v1154_v43 = vpack.c.bf16 %v1102_v41, %v1100_v40  ;;  %1068 = vmatmul.bf16.gmra.mxu2 %v2857_v2  ;;  %v2152_v2 = vld [vmem:[%s3147_s7] sm:$0xff] }
 0x29c   : > { %1608 = vmatpush.bf16.msrb.mxu1 %v2152_v2 }
 0x29d   : > { %1429 = vmatmul.bf16.gmra.mxu0 %v1154_v43 }
 0x29e   : > { %v1029_v45 = vpop.f32.mrf.mxu2 }
 0x29f   : > { %v1030_v46 = vadd.f32 %v1029_v45, %v2938_v51  ;;  %v1341_v45 = vpop.f32.mrf.mxu3 }
 0x2a1   : > { %v1104_v48 = vmax.f32 %v1030_v46, 0.0  ;;  %v1327_v46 = vadd.f32 %v2989_v5, %v2920_v32 }
 0x2a6   : > { %v1031_v47 = vpop.f32.mrf.mxu2 }
 0x2a7   : > { %v1032_v49 = vadd.f32 %v1031_v47, %v2938_v51  ;;  %v1329_v47 = vadd.f32 %v2989_v5, %v2924_v36  ;;  %v1332_v36 = vadd.f32 %v2989_v5, %v2927_v31 }
 0x2a9   : > { %v1106_v50 = vmax.f32 %v1032_v49, 0.0 }
 0x2ab   : > { %v1156_v52 = vpack.c.bf16 %v1106_v50, %v1104_v48  ;;  %1073 = vmatmul.bf16.gmra.mxu2 %v2867_v19 }
 0x2ad   : > { %1434 = vmatmul.bf16.gmra.mxu0 %v1156_v52 }
 0x2ae   : > { %v1034_v62 = vpop.f32.mrf.mxu2 }
 0x2af   : > { %v1035_v54 = vadd.f32 %v1034_v62, %v2938_v51 }
 0x2b1   : > { %v1108_v7 = vmax.f32 %v1035_v54, 0.0 }
 0x2b6   : > { %v1036_v55 = vpop.f32.mrf.mxu2 }
 0x2b7   : > { %v1037_v56 = vadd.f32 %v1036_v55, %v2938_v51 }
 0x2b9   : > { %v1110_v57 = vmax.f32 %v1037_v56, 0.0 }
 0x2bb   : > { %v1158_v60 = vpack.c.bf16 %v1110_v57, %v1108_v7  ;;  %v1343_v7 = vpop.f32.mrf.mxu3 }
 0x2bd   : > { %1439 = vmatmul.bf16.gmra.mxu0 %v1158_v60 }
 0x2be   : > { %v1039_v58 = vpop.f32.mrf.mxu2 }
 0x2bf   : > { %v1040_v59 = vadd.f32 %v1039_v58, %v2938_v51 }
 0x2c1   : > { %v1112_v0 = vmax.f32 %v1040_v59, 0.0 }
 0x2c6   : > { %v1041_v19 = vpop.f32.mrf.mxu2 }
 0x2c7   : > { %v1042_v61 = vadd.f32 %v1041_v19, %v2938_v51  ;;  %v1334_v19 = vadd.f32 %v2989_v5, %v2935_v53 }
 0x2c9   : > { %v1114_v3 = vmax.f32 %v1042_v61, 0.0 }
 0x2ca   : > { %v1405_v4 = vpop.f32.mrf.mxu0 }
 0x2cb   : > { %v1160_v24 = vpack.c.bf16 %v1114_v3, %v1112_v0  ;;  %v1406_v11 = vadd.f32 %v1405_v4, %v1317_v8  ;;  %v1346_v0 = vpop.f32.mrf.mxu3 }
 0x2cd   : > { %1444 = vmatmul.bf16.gmra.mxu0 %v1160_v24  ;;  %v1485_v14 = vmax.f32 %v1406_v11, 0.0 }
 0x2ce   : > { %v1044_v6 = vpop.f32.mrf.mxu2 }
 0x2cf   : > { %v1045_v44 = vadd.f32 %v1044_v6, %v2938_v51 }
 0x2d1   : > { %v1116_v26 = vmax.f32 %v1045_v44, 0.0 }
 0x2d2   : > { %v1407_v12 = vpop.f32.mrf.mxu0 }
 0x2d3   : > { %v1408_v13 = vadd.f32 %v1407_v12, %v1319_v10 }
 0x2d5   : > { %v1486_v15 = vmax.f32 %v1408_v13, 0.0 }
 0x2d6   : > { %v1046_v16 = vpop.f32.mrf.mxu2 }
 0x2d7   : > { %v1047_v18 = vadd.f32 %v1046_v16, %v2938_v51  ;;  %v1517_v23 = vpack.c.bf16 %v1486_v15, %v1485_v14  ;;  %v1348_v15 = vpop.f32.mrf.mxu3  ;;  %v1337_v16 = vadd.f32 %v2989_v5, %v2997_v1 }
 0x2d9   : > { %v1118_v22 = vmax.f32 %v1047_v18, 0.0  ;;  %1609 = vmatmul.bf16.vlgmr.msrb.gmra.mxu1 %v1517_v23  ;;  %v1339_v18 = vadd.f32 %v2989_v5, %v1338_v34  ;;  %v1342_v34 = vadd.f32 %v2989_v5, %v1341_v45 }
 0x2da   : > { %v1410_v63 = vpop.f32.mrf.mxu0 }
 0x2db   : > { %v1162_v27 = vpack.c.bf16 %v1118_v22, %v1116_v26  ;;  %v1411_v25 = vadd.f32 %v1410_v63, %v1322_v28 }
 0x2dd   : > { %1449 = vmatmul.bf16.gmra.mxu0 %v1162_v27  ;;  %v1487_v21 = vmax.f32 %v1411_v25, 0.0 }
 0x2de   : > { %v1049_v9 = vpop.f32.mrf.mxu2 }
 0x2df   : > { %v1050_v35 = vadd.f32 %v1049_v9, %v2938_v51  ;;  %v1351_v28 = vpop.f32.mrf.mxu3 }
 0x2e1   : > { %v1120_v41 = vmax.f32 %v1050_v35, 0.0 }
 0x2e2   : > { %v1412_v30 = vpop.f32.mrf.mxu0 }
 0x2e3   : > { %v1413_v33 = vadd.f32 %v1412_v30, %v1324_v29 }
 0x2e5   : > { %v1488_v38 = vmax.f32 %v1413_v33, 0.0 }
 0x2e6   : > { %v1051_v39 = vpop.f32.mrf.mxu2 }
 0x2e7   : > { %v1052_v37 = vadd.f32 %v1051_v39, %v2938_v51  ;;  %v1518_v40 = vpack.c.bf16 %v1488_v38, %v1487_v21  ;;  %v1353_v39 = vpop.f32.mrf.mxu3 }
 0x2e9   : > { %v1122_v43 = vmax.f32 %v1052_v37, 0.0  ;;  %1614 = vmatmul.bf16.gmra.mxu1 %v1518_v40  ;;  %v1344_v37 = vadd.f32 %v2989_v5, %v1343_v7 }
 0x2ea   : > { %v1415_v42 = vpop.f32.mrf.mxu0 }
 0x2eb   : > { %v1164_v17 = vpack.c.bf16 %v1122_v43, %v1120_v41  ;;  %v1416_v49 = vadd.f32 %v1415_v42, %v1327_v46 }
 0x2ed   : > { %1454 = vmatmul.bf16.gmra.mxu0 %v1164_v17  ;;  %v1489_v52 = vmax.f32 %v1416_v49, 0.0 }
 0x2ee   : > { %v1054_v20 = vpop.f32.mrf.mxu2 }
 0x2ef   : > { %v1055_v2 = vadd.f32 %v1054_v20, %v2938_v51 }
 0x2f1   : > { %v1124_v57 = vmax.f32 %v1055_v2, 0.0 }
 0x2f2   : > { %v1417_v48 = vpop.f32.mrf.mxu0 }
 0x2f3   : > { %v1418_v50 = vadd.f32 %v1417_v48, %v1329_v47  ;;  %v1356_v48 = vpop.f32.mrf.mxu3 }
 0x2f5   : > { %v1490_v62 = vmax.f32 %v1418_v50, 0.0 }
 0x2f6   : > { %v1056_v54 = vpop.f32.mrf.mxu2 }
 0x2f7   : > { %v1057_v55 = vadd.f32 %v1056_v54, %v2938_v51  ;;  %v1519_v56 = vpack.c.bf16 %v1490_v62, %v1489_v52  ;;  %v1347_v54 = vadd.f32 %v2989_v5, %v1346_v0 }
 0x2f9   : > { %v1126_v60 = vmax.f32 %v1057_v55, 0.0  ;;  %1619 = vmatmul.bf16.gmra.mxu1 %v1519_v56  ;;  %v1349_v55 = vadd.f32 %v2989_v5, %v1348_v15 }
 0x2fa   : > { %v1420_v58 = vpop.f32.mrf.mxu0 }
 0x2fb   : > { %v1166_v32 = vpack.c.bf16 %v1126_v60, %v1124_v57  ;;  %v1421_v61 = vadd.f32 %v1420_v58, %v1332_v36  ;;  %v1358_v7 = vpop.f32.mrf.mxu3 }
 0x2fd   : > { %1459 = vmatmul.bf16.gmra.mxu0 %v1166_v32  ;;  %v1491_v24 = vmax.f32 %v1421_v61, 0.0 }
 0x2fe   : > { %v1059_v59 = vpop.f32.mrf.mxu2 }
 0x2ff   : > { %v1060_v6 = vadd.f32 %v1059_v59, %v2938_v51 }
 0x301   : > { %v1128_v13 = vmax.f32 %v1060_v6, 0.0 }
 0x302   : > { %v1422_v3 = vpop.f32.mrf.mxu0 }
 0x303   : > { %v1423_v4 = vadd.f32 %v1422_v3, %v1334_v19  ;;  %v1361_v0 = vpop.f32.mrf.mxu3 }
 0x305   : > { %v1492_v8 = vmax.f32 %v1423_v4, 0.0 }
 0x306   : > { %v1061_v10 = vpop.f32.mrf.mxu2 }
 0x307   : > { %v1062_v11 = vadd.f32 %v1061_v10, %v2938_v51  ;;  %v1520_v12 = vpack.c.bf16 %v1492_v8, %v1491_v24  ;;  %v1352_v8 = vadd.f32 %v2989_v5, %v1351_v28  ;;  %v1354_v10 = vadd.f32 %v2989_v5, %v1353_v39 }
 0x309   : > { %v1130_v14 = vmax.f32 %v1062_v11, 0.0  ;;  %1624 = vmatmul.bf16.gmra.mxu1 %v1520_v12 }
 0x30a   : > { %v1425_v44 = vpop.f32.mrf.mxu0 }
 0x30b   : > { %v1168_v31 = vpack.c.bf16 %v1130_v14, %v1128_v13  ;;  %v1426_v23 = vadd.f32 %v1425_v44, %v1337_v16 }
 0x30d   : > { %1464 = vmatmul.bf16.gmra.mxu0 %v1168_v31  ;;  %v1493_v63 = vmax.f32 %v1426_v23, 0.0  ;;  %v1363_v31 = vpop.f32.mrf.mxu3 }
 0x30e   : > { %v1064_v53 = vpop.f32.mrf.mxu2 }
 0x30f   : > { %v1065_v27 = vadd.f32 %v1064_v53, %v2938_v51  ;;  %v1357_v53 = vadd.f32 %v2989_v5, %v1356_v48 }
 0x311   : > { %v1132_v33 = vmax.f32 %v1065_v27, 0.0 }
 0x312   : > { %v1427_v26 = vpop.f32.mrf.mxu0 }
 0x313   : > { %v1428_v22 = vadd.f32 %v1427_v26, %v1339_v18  ;;  %v1359_v18 = vadd.f32 %v2989_v5, %v1358_v7 }
 0x315   : > { %v1494_v9 = vmax.f32 %v1428_v22, 0.0  ;;  %v1366_v16 = vpop.f32.mrf.mxu3 }
 0x316   : > { %v1066_v29 = vpop.f32.mrf.mxu2  ;;  %v1367_v48 = vadd.f32 %v2989_v5, %v1366_v16 }
 0x317   : > { %v1521_v25 = vpack.c.bf16 %v1494_v9, %v1493_v63  ;;  %v1067_v30 = vadd.f32 %v1066_v29, %v2938_v51 }
 0x319   : > { %v1134_v21 = vmax.f32 %v1067_v30, 0.0  ;;  %1629 = vmatmul.bf16.gmra.mxu1 %v1521_v25  ;;  %v3038_v30 = vld [vmem:[%s3148_s8] ss:$0 sm:$0xff] }
 0x31a   : > { %v1430_v35 = vpop.f32.mrf.mxu0 }
 0x31b   : > { %v1170_v38 = vpack.c.bf16 %v1134_v21, %v1132_v33  ;;  %v1431_v40 = vadd.f32 %v1430_v35, %v1342_v34  ;;  %v1362_v21 = vadd.f32 %v2989_v5, %v1361_v0 }
 0x31d   : > { %1469 = vmatmul.bf16.gmra.mxu0 %v1170_v38  ;;  %v1495_v42 = vmax.f32 %v1431_v40, 0.0  ;;  %v1368_v29 = vpop.f32.mrf.mxu3 }
 0x31e   : > { %v1069_v1 = vpop.f32.mrf.mxu2 }
 0x31f   : > { %v1070_v17 = vadd.f32 %v1069_v1, %v2938_v51  ;;  %v1364_v1 = vadd.f32 %v2989_v5, %v1363_v31 }
 0x321   : > { %v1136_v50 = vmax.f32 %v1070_v17, 0.0 }
 0x322   : > { %v1432_v41 = vpop.f32.mrf.mxu0 }
 0x323   : > { %v1433_v43 = vadd.f32 %v1432_v41, %v1344_v37 }
 0x325   : > { %v1496_v20 = vmax.f32 %v1433_v43, 0.0  ;;  %v1371_v41 = vpop.f32.mrf.mxu3 }
 0x326   : > { %v1071_v46 = vpop.f32.mrf.mxu2 }
 0x327   : > { %v1522_v47 = vpack.c.bf16 %v1496_v20, %v1495_v42  ;;  %v1072_v49 = vadd.f32 %v1071_v46, %v2938_v51 }
 0x329   : > { %v1138_v52 = vmax.f32 %v1072_v49, 0.0  ;;  %1634 = vmatmul.bf16.gmra.mxu1 %v1522_v47 }
 0x32a   : > { %v1435_v2 = vpop.f32.mrf.mxu0 }
 0x32b   : > { %v1172_v45 = vpack.c.bf16 %v1138_v52, %v1136_v50  ;;  %v1436_v56 = vadd.f32 %v1435_v2, %v1347_v54  ;;  %v1369_v2 = vadd.f32 %v2989_v5, %v1368_v29 }
 0x32d   : > { %1474 = vmatmul.bf16.gmra.mxu0 %v1172_v45  ;;  %v1497_v58 = vmax.f32 %v1436_v56, 0.0  ;;  %v1373_v47 = vpop.f32.mrf.mxu3 }
 0x32e   : > { %v1074_v62 = vpop.f32.mrf.mxu2 }
 0x32f   : > { %v1075_v32 = vadd.f32 %v1074_v62, %v2938_v51 }
 0x331   : > { %v1140_v3 = vmax.f32 %v1075_v32, 0.0 }
 0x332   : > { %v1437_v57 = vpop.f32.mrf.mxu0 }
 0x333   : > { %v1438_v60 = vadd.f32 %v1437_v57, %v1349_v55 }
 0x335   : > { %v1498_v59 = vmax.f32 %v1438_v60, 0.0 }
 0x336   : > { %v1076_v36 = vpop.f32.mrf.mxu2 }
 0x337   : > { %v1523_v19 = vpack.c.bf16 %v1498_v59, %v1497_v58  ;;  %v1077_v61 = vadd.f32 %v1076_v36, %v2938_v51  ;;  %v1376_v58 = vpop.f32.mrf.mxu3  ;;  %v1372_v36 = vadd.f32 %v2989_v5, %v1371_v41 }
 0x339   : > { %v1142_v4 = vmax.f32 %v1077_v61, 0.0  ;;  %1639 = vmatmul.bf16.gmra.mxu1 %v1523_v19 }
 0x33a   : > { %v1440_v24 = vpop.f32.mrf.mxu0 }
 0x33b   : > { %v1174_v6 = vpack.c.bf16 %v1142_v4, %v1140_v3  ;;  %v1441_v11 = vadd.f32 %v1440_v24, %v1352_v8  ;;  %v1374_v3 = vadd.f32 %v2989_v5, %v1373_v47 }
 0x33d   : > { %1479 = vmatmul.bf16.gmra.mxu0 %v1174_v6  ;;  %v1499_v14 = vmax.f32 %v1441_v11, 0.0 }
 0x33f   : > { %v1378_v6 = vpop.f32.mrf.mxu3 }
 0x340   : > { %v1379_v16 = vadd.f32 %v2989_v5, %v1378_v6 }
 0x342   : > { %v1442_v12 = vpop.f32.mrf.mxu0 }
 0x343   : > { %v1443_v13 = vadd.f32 %v1442_v12, %v1354_v10 }
 0x345   : > { %v1500_v44 = vmax.f32 %v1443_v13, 0.0 }
 0x347   : > { %v1524_v15 = vpack.c.bf16 %v1500_v44, %v1499_v14  ;;  %v1381_v44 = vpop.f32.mrf.mxu3 }
 0x349   : > { %1644 = vmatmul.bf16.gmra.mxu1 %v1524_v15  ;;  %v1377_v15 = vadd.f32 %v2989_v5, %v1376_v58 }
 0x34a   : > { %v1445_v51 = vpop.f32.mrf.mxu0 }
 0x34b   : > { %v1446_v23 = vadd.f32 %v1445_v51, %v1357_v53 }
 0x34d   : > { %v1501_v63 = vmax.f32 %v1446_v23, 0.0 }
 0x352   : > { %v1447_v26 = vpop.f32.mrf.mxu0 }
 0x353   : > { %v1448_v22 = vadd.f32 %v1447_v26, %v1359_v18 }
 0x355   : > { %v1502_v27 = vmax.f32 %v1448_v22, 0.0 }
 0x356   : > { %v1610_v9 = vpop.f32.mrf.mxu1 }
 0x357   : > { %v1525_v28 = vpack.c.bf16 %v1502_v27, %v1501_v63  ;;  %v1611_v35 = vadd.f32 %v3038_v30, %v1610_v9  ;;  %v1383_v9 = vpop.f32.mrf.mxu3 }
 0x359   : > { %1649 = vmatmul.bf16.gmra.mxu1 %v1525_v28 }
 0x35a   : > { %v1450_v25 = vpop.f32.mrf.mxu0 }
 0x35b   : > { %v1451_v34 = vadd.f32 %v1450_v25, %v1362_v21  ;;  %v1382_v21 = vadd.f32 %v2989_v5, %v1381_v44 }
 0x35d   : > { %v1503_v43 = vmax.f32 %v1451_v34, 0.0  ;;  %v1384_v34 = vadd.f32 %v2989_v5, %v1383_v9 }
 0x35e   : > { %v1612_v33 = vpop.f32.mrf.mxu1 }
 0x35f   : > { %v1613_v38 = vadd.f32 %v3038_v30, %v1612_v33 }
 0x361   : > { %v2164_v39 = vpack.c.bf16 %v1613_v38, %v1611_v35 }
 0x362   : > { %v1452_v37 = vpop.f32.mrf.mxu0 }
 0x363   : > { %2165 = vst [vmem:[%s3046_s26] sm:$0xff] %v2164_v39   ;;  %v1453_v40 = vadd.f32 %v1452_v37, %v1364_v1  ;;  %v1386_v1 = vpop.f32.mrf.mxu3 }
 0x365   : > { %v1504_v42 = vmax.f32 %v1453_v40, 0.0 }
 0x366   : > { %v1615_v17 = vpop.f32.mrf.mxu1 }
 0x367   : > { %v1526_v20 = vpack.c.bf16 %v1504_v42, %v1503_v43  ;;  %v1616_v50 = vadd.f32 %v3038_v30, %v1615_v17 }
 0x369   : > { %1654 = vmatmul.bf16.gmra.mxu1 %v1526_v20 }
 0x36a   : > { %v1455_v46 = vpop.f32.mrf.mxu0 }
 0x36b   : > { %v1456_v45 = vadd.f32 %v1455_v46, %v1367_v48  ;;  %v1388_v46 = vpop.f32.mrf.mxu3  ;;  %v1387_v48 = vadd.f32 %v2989_v5, %v1386_v1 }
 0x36d   : > { %v1505_v56 = vmax.f32 %v1456_v45, 0.0 }
 0x36e   : > { %v1617_v49 = vpop.f32.mrf.mxu1 }
 0x36f   : > { %v1618_v52 = vadd.f32 %v3038_v30, %v1617_v49 }
 0x371   : > { %v2169_v62 = vpack.c.bf16 %v1618_v52, %v1616_v50 }
 0x372   : > { %v1457_v54 = vpop.f32.mrf.mxu0 }
 0x373   : > { %2241 = vst [vmem:[%s3046_s26 + $0x8] sm:$0xff] %v2169_v62   ;;  %v1458_v55 = vadd.f32 %v1457_v54, %v1369_v2  ;;  %v1389_v2 = vadd.f32 %v2989_v5, %v1388_v46 }
 0x375   : > { %v1506_v7 = vmax.f32 %v1458_v55, 0.0 }
 0x376   : > { %v1620_v57 = vpop.f32.mrf.mxu1 }
 0x377   : > { %v1527_v60 = vpack.c.bf16 %v1506_v7, %v1505_v56  ;;  %v1621_v19 = vadd.f32 %v3038_v30, %v1620_v57  ;;  %v1391_v56 = vpop.f32.mrf.mxu3 }
 0x379   : > { %1659 = vmatmul.bf16.gmra.mxu1 %v1527_v60 }
 0x37a   : > { %v1460_v32 = vpop.f32.mrf.mxu0 }
 0x37b   : > { %v1461_v4 = vadd.f32 %v1460_v32, %v1372_v36 }
 0x37d   : > { %v1507_v10 = vmax.f32 %v1461_v4, 0.0 }
 0x37e   : > { %v1622_v59 = vpop.f32.mrf.mxu1 }
 0x37f   : > { %v1623_v61 = vadd.f32 %v3038_v30, %v1622_v59  ;;  %v1393_v59 = vpop.f32.mrf.mxu3 }
 0x380   : > { %v1394_v4 = vadd.f32 %v2989_v5, %v1393_v59 }
 0x381   : > { %v2174_v24 = vpack.c.bf16 %v1623_v61, %v1621_v19  ;;  %v1392_v19 = vadd.f32 %v2989_v5, %v1391_v56 }
 0x382   : > { %v1462_v0 = vpop.f32.mrf.mxu0 }
 0x383   : > { %2242 = vst [vmem:[%s3046_s26 + $0x10] sm:$0xff] %v2174_v24   ;;  %v1463_v8 = vadd.f32 %v1462_v0, %v1374_v3 }
 0x385   : > { %v1508_v11 = vmax.f32 %v1463_v8, 0.0 }
 0x386   : > { %v1625_v12 = vpop.f32.mrf.mxu1 }
 0x387   : > { %v1528_v13 = vpack.c.bf16 %v1508_v11, %v1507_v10  ;;  %v1626_v51 = vadd.f32 %v3038_v30, %v1625_v12 }
 0x389   : > { %1664 = vmatmul.bf16.gmra.mxu1 %v1528_v13 }
 0x38a   : > { %v1465_v14 = vpop.f32.mrf.mxu0 }
 0x38b   : > { %v1466_v18 = vadd.f32 %v1465_v14, %v1377_v15 }
 0x38d   : > { %v1509_v63 = vmax.f32 %v1466_v18, 0.0 }
 0x38e   : > { %v1627_v31 = vpop.f32.mrf.mxu1 }
 0x38f   : > { %v1628_v53 = vadd.f32 %v3038_v30, %v1627_v31 }
 0x391   : > { %v2179_v23 = vpack.c.bf16 %v1628_v53, %v1626_v51 }
 0x392   : > { %v1467_v26 = vpop.f32.mrf.mxu0 }
 0x393   : > { %2243 = vst [vmem:[%s3046_s26 + $0x18] sm:$0xff] %v2179_v23   ;;  %v1468_v22 = vadd.f32 %v1467_v26, %v1379_v16 }
 0x395   : > { %v1510_v27 = vmax.f32 %v1468_v22, 0.0 }
 0x396   : > { %v1630_v28 = vpop.f32.mrf.mxu1 }
 0x397   : > { %v1529_v29 = vpack.c.bf16 %v1510_v27, %v1509_v63  ;;  %v1631_v35 = vadd.f32 %v3038_v30, %v1630_v28 }
 0x399   : > { %1669 = vmatmul.bf16.gmra.mxu1 %v1529_v29 }
 0x39a   : > { %v1470_v25 = vpop.f32.mrf.mxu0 }
 0x39b   : > { %v1471_v39 = vadd.f32 %v1470_v25, %v1382_v21 }
 0x39d   : > { %v1511_v43 = vmax.f32 %v1471_v39, 0.0 }
 0x39e   : > { %v1632_v33 = vpop.f32.mrf.mxu1 }
 0x39f   : > { %v1633_v38 = vadd.f32 %v3038_v30, %v1632_v33 }
 0x3a1   : > { %v2184_v37 = vpack.c.bf16 %v1633_v38, %v1631_v35 }
 0x3a2   : > { %v1472_v40 = vpop.f32.mrf.mxu0 }
 0x3a3   : > { %2244 = vst [vmem:[%s3046_s26 + $0x20] sm:$0xff] %v2184_v37   ;;  %v1473_v41 = vadd.f32 %v1472_v40, %v1384_v34 }
 0x3a5   : > { %v1512_v42 = vmax.f32 %v1473_v41, 0.0 }
 0x3a6   : > { %v1635_v17 = vpop.f32.mrf.mxu1 }
 0x3a7   : > { %v1530_v20 = vpack.c.bf16 %v1512_v42, %v1511_v43  ;;  %v1636_v50 = vadd.f32 %v3038_v30, %v1635_v17 }
 0x3a9   : > { %1674 = vmatmul.bf16.gmra.mxu1 %v1530_v20 }
 0x3aa   : > { %v1475_v47 = vpop.f32.mrf.mxu0 }
 0x3ab   : > { %v1476_v45 = vadd.f32 %v1475_v47, %v1387_v48 }
 0x3ad   : > { %v1513_v7 = vmax.f32 %v1476_v45, 0.0 }
 0x3ae   : > { %v1637_v49 = vpop.f32.mrf.mxu1 }
 0x3af   : > { %v1638_v52 = vadd.f32 %v3038_v30, %v1637_v49 }
 0x3b1   : > { %v2189_v62 = vpack.c.bf16 %v1638_v52, %v1636_v50 }
 0x3b2   : > { %v1477_v54 = vpop.f32.mrf.mxu0 }
 0x3b3   : > { %2245 = vst [vmem:[%s3046_s26 + $0x28] sm:$0xff] %v2189_v62   ;;  %v1478_v55 = vadd.f32 %v1477_v54, %v1389_v2 }
 0x3b5   : > { %v1514_v57 = vmax.f32 %v1478_v55, 0.0 }
 0x3b6   : > { %v1640_v60 = vpop.f32.mrf.mxu1 }
 0x3b7   : > { %v1531_v58 = vpack.c.bf16 %v1514_v57, %v1513_v7  ;;  %v1641_v61 = vadd.f32 %v3038_v30, %v1640_v60 }
 0x3b9   : > { %1679 = vmatmul.bf16.gmra.mxu1 %v1531_v58 }
 0x3ba   : > { %v1480_v32 = vpop.f32.mrf.mxu0 }
 0x3bb   : > { %v1481_v24 = vadd.f32 %v1480_v32, %v1392_v19 }
 0x3bd   : > { %v1515_v10 = vmax.f32 %v1481_v24, 0.0 }
 0x3be   : > { %v1642_v36 = vpop.f32.mrf.mxu1 }
 0x3bf   : > { %v1643_v3 = vadd.f32 %v3038_v30, %v1642_v36 }
 0x3c1   : > { %v2194_v6 = vpack.c.bf16 %v1643_v3, %v1641_v61 }
 0x3c2   : > { %v1482_v0 = vpop.f32.mrf.mxu0 }
 0x3c3   : > { %2246 = vst [vmem:[%s3046_s26 + $0x30] sm:$0xff] %v2194_v6   ;;  %v1483_v8 = vadd.f32 %v1482_v0, %v1394_v4 }
 0x3c5   : > { %v1516_v11 = vmax.f32 %v1483_v8, 0.0 }
 0x3c6   : > { %v1645_v12 = vpop.f32.mrf.mxu1 }
 0x3c7   : > { %v1532_v13 = vpack.c.bf16 %v1516_v11, %v1515_v10  ;;  %v1646_v44 = vadd.f32 %v3038_v30, %v1645_v12 }
 0x3c9   : > { %1684 = vmatmul.bf16.gmra.mxu1 %v1532_v13 }
 0x3ce   : > { %v1647_v14 = vpop.f32.mrf.mxu1 }
 0x3cf   : > { %v1648_v31 = vadd.f32 %v3038_v30, %v1647_v14 }
 0x3d1   : > { %v2199_v15 = vpack.c.bf16 %v1648_v31, %v1646_v44 }
 0x3d3   : > { %2247 = vst [vmem:[%s3046_s26 + $0x38] sm:$0xff] %v2199_v15  }
 0x3d6   : > { %v1650_v5 = vpop.f32.mrf.mxu1 }
 0x3d7   : > { %v1651_v53 = vadd.f32 %v3038_v30, %v1650_v5 }
 0x3de   : > { %v1652_v51 = vpop.f32.mrf.mxu1 }
 0x3df   : > { %v1653_v16 = vadd.f32 %v3038_v30, %v1652_v51 }
 0x3e1   : > { %v2204_v18 = vpack.c.bf16 %v1653_v16, %v1651_v53 }
 0x3e3   : > { %2248 = vst [vmem:[%s3046_s26 + $0x40] sm:$0xff] %v2204_v18  }
 0x3e6   : > { %v1655_v23 = vpop.f32.mrf.mxu1 }
 0x3e7   : > { %v1656_v22 = vadd.f32 %v3038_v30, %v1655_v23 }
 0x3ee   : > { %v1657_v26 = vpop.f32.mrf.mxu1 }
 0x3ef   : > { %v1658_v63 = vadd.f32 %v3038_v30, %v1657_v26 }
 0x3f1   : > { %v2209_v27 = vpack.c.bf16 %v1658_v63, %v1656_v22 }
 0x3f3   : > { %2249 = vst [vmem:[%s3046_s26 + $0x48] sm:$0xff] %v2209_v27  }
 0x3f6   : > { %v1660_v9 = vpop.f32.mrf.mxu1 }
 0x3f7   : > { %v1661_v29 = vadd.f32 %v3038_v30, %v1660_v9 }
 0x3fe   : > { %v1662_v28 = vpop.f32.mrf.mxu1 }
 0x3ff   : > { %v1663_v25 = vadd.f32 %v3038_v30, %v1662_v28 }
 0x401   : > { %v2214_v33 = vpack.c.bf16 %v1663_v25, %v1661_v29 }
 0x403   : > { %2250 = vst [vmem:[%s3046_s26 + $0x50] sm:$0xff] %v2214_v33  }
 0x406   : > { %v1665_v21 = vpop.f32.mrf.mxu1 }
 0x407   : > { %v1666_v38 = vadd.f32 %v3038_v30, %v1665_v21 }
 0x40e   : > { %v1667_v35 = vpop.f32.mrf.mxu1 }
 0x40f   : > { %v1668_v1 = vadd.f32 %v3038_v30, %v1667_v35 }
 0x411   : > { %v2219_v34 = vpack.c.bf16 %v1668_v1, %v1666_v38 }
 0x413   : > { %2251 = vst [vmem:[%s3046_s26 + $0x58] sm:$0xff] %v2219_v34  }
 0x416   : > { %v1670_v39 = vpop.f32.mrf.mxu1 }
 0x417   : > { %v1671_v40 = vadd.f32 %v3038_v30, %v1670_v39 }
 0x41e   : > { %v1672_v37 = vpop.f32.mrf.mxu1 }
 0x41f   : > { %v1673_v41 = vadd.f32 %v3038_v30, %v1672_v37 }
 0x421   : > { %v2224_v43 = vpack.c.bf16 %v1673_v41, %v1671_v40 }
 0x423   : > { %2252 = vst [vmem:[%s3046_s26 + $0x60] sm:$0xff] %v2224_v43  }
 0x426   : > { %v1675_v42 = vpop.f32.mrf.mxu1 }
 0x427   : > { %v1676_v20 = vadd.f32 %v3038_v30, %v1675_v42 }
 0x42e   : > { %v1677_v17 = vpop.f32.mrf.mxu1 }
 0x42f   : > { %v1678_v46 = vadd.f32 %v3038_v30, %v1677_v17 }
 0x431   : > { %v2229_v47 = vpack.c.bf16 %v1678_v46, %v1676_v20 }
 0x433   : > { %2253 = vst [vmem:[%s3046_s26 + $0x68] sm:$0xff] %v2229_v47  }
 0x436   : > { %v1680_v49 = vpop.f32.mrf.mxu1 }
 0x437   : > { %v1681_v50 = vadd.f32 %v3038_v30, %v1680_v49 }
 0x43e   : > { %v1682_v48 = vpop.f32.mrf.mxu1 }
 0x43f   : > { %v1683_v52 = vadd.f32 %v3038_v30, %v1682_v48 }
 0x441   : > { %v2234_v2 = vpack.c.bf16 %v1683_v52, %v1681_v50 }
 0x443   : > { %2254 = vst [vmem:[%s3046_s26 + $0x70] sm:$0xff] %v2234_v2  }
 0x446   : > { %v1685_v45 = vpop.f32.mrf.mxu1 }
 0x447   : > { %v1686_v54 = vadd.f32 %v3038_v30, %v1685_v45 }
 0x44e   : > { %v1687_v62 = vpop.f32.mrf.mxu1 }
 0x44f   : > { %v1688_v55 = vadd.f32 %v3038_v30, %v1687_v62 }
 0x451   : > { %v2239_v56 = vpack.c.bf16 %v1688_v55, %v1686_v54 }
 0x453   : > { %2255 = vst [vmem:[%s3046_s26 + $0x78] sm:$0xff] %v2239_v56  }
 0x454   : > { %2340 = shalt.err (!%p2337_p3)
}
 0x455   : > { %s2378_s16 = smov 64   ;;  %s2379_s26 = smov 4  }
 0x456   : > { %2268 = dma.vmem_to_hbm [thread:$0]  (%p2468_p5), %s1768_s17, 2048, %s1770_s21, %s1755_s22, %s2378_s16, %s2378_s16, %s2379_s26  }
 0x457 PF: > { %p2274_p4 = scmp.ge.s32.totalorder %s2375_s12, 2  ;;  %s1784_s14 = sand.u32 1, %s2363_s30  }
 0x458   : > { %s1785_s24 = scalar_lea.sflag [#allocation4], %s1784_s14 }
 0x459   : > { %p2271_p7 = pnand %p2274_p4, %p2472_p6 }
 0x45b   : > { %p2272_p8 = pneg %p2271_p7 }
 0x45d   : > { %2358 = dma.done.wait (%p2272_p8), %s1785_s24, 2048  }
 0x45e   : > { %2360 = vsyncadd (%p2272_p8), %s1785_s24, 4294965248  ;;  %p19_p9 = scmp.ge.s32.totalorder %s2455_s15, 4   ;;  %s3152_s30 = smov %s2367_s10 }
 0x45f   : > { %s3153_s10 = smov %s2371_s11  ;;  %s3154_s11 = smov %s2466_s18 }
 0x460   : > { %s3155_s12 = smov %s2455_s15  ;;  %21 = sbr.rel (!%p19_p9) target bundleno = 3 (0x3), region = 91 }
 0x465   :  { %1791 = vsyncpa [#allocation4], 1 }
 0x466   :  { %1793 = vsyncpa [#allocation4 + $0x1], 1 }

</bundles_post_ra>
